<compile_context>
chip_gen: v6e
topology: v6e:2x2x1
jax: 0.10.0
libtpu: 0.0.40
codegen_flags: <defaults>
</compile_context>

<pallas_src>
import math
import functools

import jax
import jax.numpy as jnp
import numpy as np
from jax.experimental import pallas as pl
from jax.experimental.pallas import tpu as pltpu

_NEG_BIG = -1e30          # finite "-inf" to keep exp/max NaN-free
_INV_SQRT2 = 1.0 / math.sqrt(2.0)


def _tile(n, t):
    """Clamp tile to the dim; require even division (test shapes guarantee it)."""
    t = min(t, n)
    assert n % t == 0, f"dim {n} not divisible by tile {t}"
    return t


def _bytes(shape, dtype):
    return int(np.prod(shape)) * jnp.dtype(dtype).itemsize


def _vmem_limit(block_bytes, scratch_bytes=0):
    """Scoped-VMEM budget: double-buffered blocks + scratch + 50% margin."""
    need = int((2 * block_bytes + scratch_bytes) * 1.5) + (1 << 20)
    return int(min(128 * 1024 * 1024, max(32 * 1024 * 1024, need)))


# -------------------- RMSNorm fused into a tiled matmul ---------------------
def _rmsnorm_matmul_kernel(x_ref, nw_ref, w_ref, o_ref, xn_ref, *, eps):
    # Normalize once per m-tile (n == 0) into a VMEM scratch; every n-tile
    # then only does the bf16 MXU matmul against its weight slab.
    @pl.when(pl.program_id(1) == 0)
    def _norm():
        x = x_ref[...].astype(jnp.float32)
        var = jnp.mean(x * x, axis=-1, keepdims=True)
        xn = (x * jax.lax.rsqrt(var + eps)) * nw_ref[...].astype(jnp.float32)
        xn_ref[...] = xn.astype(xn_ref.dtype)

    o_ref[...] = jnp.dot(xn_ref[...], w_ref[...],
                         preferred_element_type=jnp.float32).astype(o_ref.dtype)


def rmsnorm_matmul(x2d, norm_w, w_t, *, eps=1e-6, tm=512, tn=512,
                   out_dtype=None):
    M, K = x2d.shape
    K2, N = w_t.shape
    assert K == K2
    tm = _tile(M, tm)
    tn = _tile(N, tn)
    out_dtype = out_dtype or x2d.dtype
    blocks = (_bytes((tm, K), x2d.dtype) + _bytes((1, K), norm_w.dtype)
              + _bytes((K, tn), w_t.dtype) + _bytes((tm, tn), out_dtype))
    return pl.pallas_call(
        functools.partial(_rmsnorm_matmul_kernel, eps=eps),
        out_shape=jax.ShapeDtypeStruct((M, N), out_dtype),
        grid=(M // tm, N // tn),
        in_specs=[pl.BlockSpec((tm, K), lambda m, n: (m, 0)),
                  pl.BlockSpec((1, K), lambda m, n: (0, 0)),
                  pl.BlockSpec((K, tn), lambda m, n: (0, n))],
        out_specs=pl.BlockSpec((tm, tn), lambda m, n: (m, n)),
        scratch_shapes=[pltpu.VMEM((tm, K), w_t.dtype)],   # normalized x (bf16)
        compiler_params=pltpu.CompilerParams(
            dimension_semantics=("parallel", "arbitrary"),
            vmem_limit_bytes=_vmem_limit(blocks, _bytes((tm, K), w_t.dtype))),
    )(x2d, norm_w.reshape(1, K), w_t)


# ---------------- tiled matmul with fused residual add (o_proj) -------------
def _matmul_residual_kernel(x_ref, w_ref, r_ref, o_ref):
    acc = jnp.dot(x_ref[...].astype(w_ref.dtype), w_ref[...],
                  preferred_element_type=jnp.float32)
    o_ref[...] = (acc + r_ref[...].astype(jnp.float32)).astype(o_ref.dtype)


def matmul_residual(x2d, w_t, residual, *, tm=512, tn=512):
    M, K = x2d.shape
    K2, N = w_t.shape
    assert K == K2 and residual.shape == (M, N)
    tm = _tile(M, tm)
    tn = _tile(N, tn)
    blocks = (_bytes((tm, K), x2d.dtype) + _bytes((K, tn), w_t.dtype)
              + 2 * _bytes((tm, tn), residual.dtype))
    return pl.pallas_call(
        _matmul_residual_kernel,
        out_shape=jax.ShapeDtypeStruct((M, N), residual.dtype),
        grid=(M // tm, N // tn),
        in_specs=[pl.BlockSpec((tm, K), lambda m, n: (m, 0)),
                  pl.BlockSpec((K, tn), lambda m, n: (0, n)),
                  pl.BlockSpec((tm, tn), lambda m, n: (m, n))],
        out_specs=pl.BlockSpec((tm, tn), lambda m, n: (m, n)),
        compiler_params=pltpu.CompilerParams(
            dimension_semantics=("parallel", "parallel"),
            vmem_limit_bytes=_vmem_limit(blocks)),
    )(x2d, w_t, residual)


# ------------ fully fused MLP: RMSNorm + gate/up + GELU + down + res --------
def _fused_mlp_kernel(x_ref, nw_ref, wg_ref, wu_ref, wd_ref, o_ref,
                      xn_ref, acc_ref, *, eps):
    i = pl.program_id(1)
    ni = pl.num_programs(1)

    @pl.when(i == 0)
    def _init():
        x = x_ref[...].astype(jnp.float32)
        var = jnp.mean(x * x, axis=-1, keepdims=True)
        xn = (x * jax.lax.rsqrt(var + eps)) * nw_ref[...].astype(jnp.float32)
        xn_ref[...] = xn.astype(xn_ref.dtype)
        acc_ref[...] = jnp.zeros_like(acc_ref)

    xn = xn_ref[...]                                              # (tm, H) bf16
    gate = jnp.dot(xn, wg_ref[...], preferred_element_type=jnp.float32)
    up = jnp.dot(xn, wu_ref[...], preferred_element_type=jnp.float32)
    # exact (erf) GELU — matches torch.nn.functional.gelu default in the spec
    inter = 0.5 * gate * (1.0 + jax.lax.erf(gate * _INV_SQRT2)) * up
    acc_ref[...] += jnp.dot(inter.astype(wd_ref.dtype), wd_ref[...],
                            preferred_element_type=jnp.float32)

    @pl.when(i == ni - 1)
    def _fin():
        # residual is the (unnormalized) input block itself
        o_ref[...] = (acc_ref[...] +
                      x_ref[...].astype(jnp.float32)).astype(o_ref.dtype)


def fused_mlp(x2d, norm_w, wg_t, wu_t, wd_t, *, eps=1e-6, tm=256, ti=512):
    M, H = x2d.shape
    I = wg_t.shape[1]
    assert wg_t.shape == (H, I) and wu_t.shape == (H, I) and wd_t.shape == (I, H)
    tm = _tile(M, tm)
    ti = _tile(I, ti)
    blocks = (2 * _bytes((tm, H), x2d.dtype) + _bytes((1, H), norm_w.dtype)
              + 2 * _bytes((H, ti), wg_t.dtype) + _bytes((ti, H), wd_t.dtype))
    scratch = _bytes((tm, H), wg_t.dtype) + _bytes((tm, H), jnp.float32)
    return pl.pallas_call(
        functools.partial(_fused_mlp_kernel, eps=eps),
        out_shape=jax.ShapeDtypeStruct((M, H), x2d.dtype),
        grid=(M // tm, I // ti),
        in_specs=[pl.BlockSpec((tm, H), lambda m, i: (m, 0)),
                  pl.BlockSpec((1, H), lambda m, i: (0, 0)),
                  pl.BlockSpec((H, ti), lambda m, i: (0, i)),
                  pl.BlockSpec((H, ti), lambda m, i: (0, i)),
                  pl.BlockSpec((ti, H), lambda m, i: (i, 0))],
        out_specs=pl.BlockSpec((tm, H), lambda m, i: (m, 0)),
        scratch_shapes=[pltpu.VMEM((tm, H), wg_t.dtype),      # normalized x
                        pltpu.VMEM((tm, H), jnp.float32)],    # down accumulator
        compiler_params=pltpu.CompilerParams(
            dimension_semantics=("parallel", "arbitrary"),
            vmem_limit_bytes=_vmem_limit(blocks, scratch)),
    )(x2d, norm_w.reshape(1, H), wg_t, wu_t, wd_t)


# ------------------- one-pass K RoPE (applied to K only once) ---------------
def _rope_k_kernel(qkv_ref, cos_ref, sin_ref, o_ref, *, head_dim, num_kv_heads):
    D = head_dim
    c = cos_ref[...]
    s = sin_ref[...]
    for h in range(num_kv_heads):
        kh = qkv_ref[0, :, h * D:(h + 1) * D].astype(jnp.float32)
        kh_rot = pltpu.roll(kh, shift=D // 2, axis=1)
        o_ref[0, :, h * D:(h + 1) * D] = (kh * c + kh_rot * s).astype(o_ref.dtype)


def rope_k(qkv3, cos, sin_signed, *, num_q_heads, num_kv_heads, head_dim,
           ts=256):
    B, S, Ntot = qkv3.shape
    D, kvH, nH = head_dim, num_kv_heads, num_q_heads
    G = nH // kvH
    Nkv = kvH * D
    assert Ntot == (nH + 2 * kvH) * D
    ts = _tile(S, ts)
    blocks = 2 * _bytes((1, ts, Nkv), qkv3.dtype) + 2 * _bytes((ts, D), cos.dtype)
    return pl.pallas_call(
        functools.partial(_rope_k_kernel, head_dim=D, num_kv_heads=kvH),
        out_shape=jax.ShapeDtypeStruct((B, S, Nkv), qkv3.dtype),
        grid=(B, S // ts),
        in_specs=[
            # the K columns of the fused QKV output start at Nq = G*Nkv
            pl.BlockSpec((1, ts, Nkv), lambda b, s: (b, s, G)),
            pl.BlockSpec((ts, D), lambda b, s: (s, 0)),
            pl.BlockSpec((ts, D), lambda b, s: (s, 0)),
        ],
        out_specs=pl.BlockSpec((1, ts, Nkv), lambda b, s: (b, s, 0)),
        compiler_params=pltpu.CompilerParams(
            dimension_semantics=("parallel", "parallel"),
            vmem_limit_bytes=_vmem_limit(blocks)),
    )(qkv3, cos, sin_signed)


# --------- flash attention (causal, GQA-grouped heads, fused Q RoPE) --------
def _flash_attn_kernel(q_ref, k_ref, v_ref, cos_ref, sin_ref, o_ref,
                       qrot_ref, m_ref, l_ref, acc_ref,
                       *, scale, tq, tk, groups, head_dim):
    qi = pl.program_id(2)
    ki = pl.program_id(3)
    nk = pl.num_programs(3)
    G, D = groups, head_dim

    @pl.when(ki == 0)
    def _init():
        c = cos_ref[...]
        s = sin_ref[...]
        for g in range(G):                       # static, small (GQA groups)
            qg = q_ref[0, :, g * D:(g + 1) * D].astype(jnp.float32)
            qg_rot = pltpu.roll(qg, shift=D // 2, axis=1)
            qr = (qg * c + qg_rot * s) * scale
            qrot_ref[g * tq:(g + 1) * tq, :] = qr.astype(qrot_ref.dtype)
        m_ref[...] = jnp.full_like(m_ref, _NEG_BIG)
        l_ref[...] = jnp.zeros_like(l_ref)
        acc_ref[...] = jnp.zeros_like(acc_ref)

    first_row = qi * tq
    last_row = first_row + (tq - 1)
    first_col = ki * tk
    last_col = first_col + (tk - 1)

    def _scores():
        k = k_ref[0]                                               # (tk, D)
        qr = qrot_ref[...]                                         # (G*tq, D)
        return jax.lax.dot_general(qr, k, (((1,), (1,)), ((), ())),
                                   preferred_element_type=jnp.float32)

    def _update(s):
        v = v_ref[0]                                               # (tk, D)
        m_prev = m_ref[...]
        m_new = jnp.maximum(m_prev, jnp.max(s, axis=-1, keepdims=True))
        alpha = jnp.exp(m_prev - m_new)
        p = jnp.exp(s - m_new)
        l_ref[...] = alpha * l_ref[...] + jnp.sum(p, axis=-1, keepdims=True)
        acc_ref[...] = alpha * acc_ref[...] + jax.lax.dot_general(
            p.astype(v.dtype), v, (((1,), (0,)), ((), ())),
            preferred_element_type=jnp.float32)
        m_ref[...] = m_new

    # kv tile fully below the causal diagonal: no mask work at all
    @pl.when(last_col <= first_row)
    def _unmasked():
        _update(_scores())

    # kv tile straddling the diagonal: build the mask only here
    @pl.when(jnp.logical_and(first_col <= last_row, last_col > first_row))
    def _masked():
        s = _scores()
        rows = first_row + jax.lax.broadcasted_iota(
            jnp.int32, (G, tq, tk), 1).reshape(G * tq, tk)
        cols = first_col + jax.lax.broadcasted_iota(
            jnp.int32, (G * tq, tk), 1)
        _update(jnp.where(cols <= rows, s, _NEG_BIG))

    @pl.when(ki == nk - 1)
    def _fin():
        inv_l = pl.reciprocal(l_ref[...], approx=True)             # (G*tq, 1)
        for g in range(G):
            og = acc_ref[g * tq:(g + 1) * tq, :] * inv_l[g * tq:(g + 1) * tq, :]
            o_ref[0, :, g * D:(g + 1) * D] = og.astype(o_ref.dtype)


def flash_attention(qkv3, k_rot3, cos, sin_signed, *, num_q_heads,
                    num_kv_heads, head_dim, tq=256, tk=512, out_dtype=None):
    B, S, Ntot = qkv3.shape
    nH, kvH, D = num_q_heads, num_kv_heads, head_dim
    G = nH // kvH
    H = nH * D
    assert Ntot == (nH + 2 * kvH) * D and k_rot3.shape == (B, S, kvH * D)
    assert D % 128 == 0, "head_dim must be a multiple of 128 for lane offsets"
    tq = _tile(S, tq)
    tk = _tile(S, tk)
    out_dtype = out_dtype or qkv3.dtype
    scale = 1.0 / math.sqrt(D)

    def _kv_block(qi, ki):
        # clamp kv block index so tiles above the diagonal re-use the previous
        # block -> Pallas elides the (unused) DMA for skipped causal tiles
        return jnp.minimum(ki, (qi * tq + tq - 1) // tk)

    blocks = (2 * _bytes((1, tq, G * D), qkv3.dtype)
              + 2 * _bytes((1, tk, D), qkv3.dtype)
              + 2 * _bytes((tq, D), cos.dtype))
    scratch = (_bytes((G * tq, D), qkv3.dtype)
               + 2 * _bytes((G * tq, 1), jnp.float32)
               + _bytes((G * tq, D), jnp.float32))

    return pl.pallas_call(
        functools.partial(_flash_attn_kernel, scale=scale, tq=tq, tk=tk,
                          groups=G, head_dim=D),
        out_shape=jax.ShapeDtypeStruct((B, S, H), out_dtype),
        grid=(B, kvH, S // tq, S // tk),
        in_specs=[
            # Q: all G query heads of kv-head h, straight from the QKV output
            pl.BlockSpec((1, tq, G * D), lambda b, h, qi, ki: (b, qi, h)),
            # K: pre-rotated keys of kv-head h
            pl.BlockSpec((1, tk, D),
                         lambda b, h, qi, ki: (b, _kv_block(qi, ki), h)),
            # V: straight from the QKV output (columns after Q and K)
            pl.BlockSpec((1, tk, D),
                         lambda b, h, qi, ki: (b, _kv_block(qi, ki),
                                               nH + kvH + h)),
            pl.BlockSpec((tq, D), lambda b, h, qi, ki: (qi, 0)),   # cos (q)
            pl.BlockSpec((tq, D), lambda b, h, qi, ki: (qi, 0)),   # sin (q)
        ],
        # output written directly in (B, S, H) layout -> no XLA transpose
        out_specs=pl.BlockSpec((1, tq, G * D), lambda b, h, qi, ki: (b, qi, h)),
        scratch_shapes=[pltpu.VMEM((G * tq, D), qkv3.dtype),       # rotated q
                        pltpu.VMEM((G * tq, 1), jnp.float32),      # running max
                        pltpu.VMEM((G * tq, 1), jnp.float32),      # running sum
                        pltpu.VMEM((G * tq, D), jnp.float32)],     # output acc
        compiler_params=pltpu.CompilerParams(
            dimension_semantics=("parallel", "parallel", "parallel",
                                 "arbitrary"),
            vmem_limit_bytes=_vmem_limit(blocks, scratch)),
    )(qkv3, k_rot3, qkv3, cos, sin_signed)


# --------------------------- decoder layer (glue) ---------------------------
def mistral_decoder_layer(x, params, cfg, *, eps=1e-6, tiles=None,
                          compute_dtype=jnp.bfloat16):
    t = dict(tm=512, tn=512, ti=512, tq=256, tk=512, ts=256)
    if tiles:
        t.update(tiles)
    tm_mlp = t.get("tm_mlp", min(t["tm"], 256))   # v7x 64 MiB VMEM budget

    B, S, H = x.shape
    nH = cfg["num_attention_heads"]
    kvH = cfg["num_key_value_heads"]
    D = H // nH
    G = nH // kvH
    Nq, Nkv = nH * D, kvH * D
    Ntot = Nq + 2 * Nkv
    cdt = compute_dtype

    x2d = x.reshape(B * S, H)

    # Pre-transposed, fused, bf16 weights (done once at model load time).
    wqkv_t = jnp.concatenate([params["q_proj"].T, params["k_proj"].T,
                              params["v_proj"].T], axis=1).astype(cdt)
    wo_t = params["o_proj"].T.astype(cdt)
    wg_t = params["gate_proj"].T.astype(cdt)
    wu_t = params["up_proj"].T.astype(cdt)
    wd_t = params["down_proj"].T.astype(cdt)

    # RoPE tables (position_ids = arange(S)); sin is pre-multiplied by the
    # rotate-half sign so kernels only need pltpu.roll + 2 FMAs.
    inv_freq = 1.0 / (cfg["rope_theta"] **
                      (jnp.arange(0, D, 2, dtype=jnp.float32) / D))
    theta = jnp.concatenate([inv_freq, inv_freq], axis=-1)          # (D,)
    ang = jnp.arange(S, dtype=jnp.float32)[:, None] * theta[None]   # (S, D)
    cos = jnp.cos(ang)
    sign = jnp.concatenate([-jnp.ones((D // 2,), jnp.float32),
                            jnp.ones((D // 2,), jnp.float32)])
    sin_signed = jnp.sin(ang) * sign[None, :]

    # --- attention block: RMSNorm fused into the (single) QKV projection ---
    qkv = rmsnorm_matmul(x2d, params["input_layernorm"], wqkv_t, eps=eps,
                         tm=t["tm"], tn=t["tn"], out_dtype=cdt)
    qkv3 = qkv.reshape(B, S, Ntot)                                  # free

    # K RoPE applied exactly once (not per flash kv step).
    k_rot3 = rope_k(qkv3, cos, sin_signed, num_q_heads=nH, num_kv_heads=kvH,
                    head_dim=D, ts=t["ts"])

    # Flash attention reads Q/V straight out of qkv3 and writes (B, S, H).
    attn = flash_attention(qkv3, k_rot3, cos, sin_signed, num_q_heads=nH,
                           num_kv_heads=kvH, head_dim=D,
                           tq=t["tq"], tk=t["tk"], out_dtype=cdt)
    attn2d = attn.reshape(B * S, H)                                 # free

    # o_proj with the residual add fused into the epilogue (f32 residual).
    h2d = matmul_residual(attn2d, wo_t, x2d, tm=t["tm"], tn=t["tn"])

    # --- MLP block: RMSNorm + gate/up + GELU + down + residual, all fused ---
    out2d = fused_mlp(h2d, params["post_attention_layernorm"],
                      wg_t, wu_t, wd_t, eps=eps, tm=tm_mlp, ti=t["ti"])
    return out2d.reshape(B, S, H)


# ------------------------- pure-JAX reference check -------------------------
def reference_decoder_layer(x, params, cfg, eps=1e-6):
    B, S, H = x.shape
    nH = cfg["num_attention_heads"]
    kvH = cfg["num_key_value_heads"]
    D = H // nH
    groups = nH // kvH

    def rms(h, w):
        var = jnp.mean(h.astype(jnp.float32) ** 2, axis=-1, keepdims=True)
        return w * (h * jax.lax.rsqrt(var + eps))

    residual = x
    h = rms(x, params["input_layernorm"])
    q = (h @ params["q_proj"].T).reshape(B, S, nH, D).transpose(0, 2, 1, 3)
    k = (h @ params["k_proj"].T).reshape(B, S, kvH, D).transpose(0, 2, 1, 3)
    v = (h @ params["v_proj"].T).reshape(B, S, kvH, D).transpose(0, 2, 1, 3)

    inv_freq = 1.0 / (cfg["rope_theta"] **
                      (jnp.arange(0, D, 2, dtype=jnp.float32) / D))
    theta = jnp.concatenate([inv_freq, inv_freq])
    ang = jnp.arange(S, dtype=jnp.float32)[:, None] * theta[None]
    cos = jnp.cos(ang)[None, None]
    sin = jnp.sin(ang)[None, None]

    def rope(tq):
        t1, t2 = tq[..., :D // 2], tq[..., D // 2:]
        return tq * cos + jnp.concatenate([-t2, t1], axis=-1) * sin

    q, k = rope(q), rope(k)
    k = jnp.repeat(k, groups, axis=1)
    v = jnp.repeat(v, groups, axis=1)

    scores = jnp.einsum("bhqd,bhkd->bhqk", q, k) / math.sqrt(D)
    mask = jnp.tril(jnp.ones((S, S), dtype=bool))
    scores = jnp.where(mask, scores, -jnp.inf)
    attn = jax.nn.softmax(scores, axis=-1)
    ao = jnp.einsum("bhqk,bhkd->bhqd", attn, v)
    ao = ao.transpose(0, 2, 1, 3).reshape(B, S, H) @ params["o_proj"].T

    h = ao + residual
    residual = h
    h = rms(h, params["post_attention_layernorm"])
    gate = h @ params["gate_proj"].T
    up = h @ params["up_proj"].T
    inter = jax.nn.gelu(gate, approximate=False) * up
    return residual + inter @ params["down_proj"].T


# ----------------------------------- main -----------------------------------
if __name__ == "__main__":
    # Small (but tile-exercising) shapes: real Mistral head_dim, reduced counts.
    B, S = 2, 128
    nH, kvH, D = 4, 2, 128
    H = nH * D                 # 512
    I = 1024
    cfg = dict(num_attention_heads=nH, num_key_value_heads=kvH,
               hidden_size=H, intermediate_size=I,
               rope_theta=10000.0, attention_dropout=0.0)

    key = jax.random.PRNGKey(0)
    ks = jax.random.split(key, 8)

    def init(k, shape):
        return 0.02 * jax.random.normal(k, shape, dtype=jnp.float32)

    params = {
        "q_proj": init(ks[0], (H, H)),
        "k_proj": init(ks[1], (kvH * D, H)),
        "v_proj": init(ks[2], (kvH * D, H)),
        "o_proj": init(ks[3], (H, H)),
        "gate_proj": init(ks[4], (I, H)),
        "up_proj": init(ks[5], (I, H)),
        "down_proj": init(ks[6], (H, I)),
        "input_layernorm": jnp.ones((H,), jnp.float32),
        "post_attention_layernorm": jnp.ones((H,), jnp.float32),
    }

    x = jax.random.normal(ks[7], (B, S, H), dtype=jnp.float32)

    # Small tiles so multiple grid steps (K-accumulation, flash kv loop,
    # causal tile skipping / clamped DMAs) are actually exercised here.
    test_tiles = dict(tm=128, tn=128, ti=256, tq=64, tk=64, ts=64)

    out = mistral_decoder_layer(x, params, cfg, tiles=test_tiles)
    out = jax.block_until_ready(out)

    ref = reference_decoder_layer(x, params, cfg)
    assert out.shape == (B, S, H)
    np.testing.assert_allclose(np.asarray(out, dtype=np.float32),
                               np.asarray(ref, dtype=np.float32),
                               rtol=2e-2, atol=2e-2)
    print("KERNEL_OK")
</pallas_src>

<mosaic_0001>
module attributes {stable_mosaic.version = 11 : i64} {
  func.func @_rmsnorm_matmul_kernel(%arg0: i32, %arg1: i32, %arg2: memref<128x512xf32, #tpu.memory_space<vmem>>, %arg3: memref<1x512xf32, #tpu.memory_space<vmem>>, %arg4: memref<512x128xbf16, #tpu.memory_space<vmem>>, %arg5: memref<128x128xbf16, #tpu.memory_space<vmem>>, %arg6: memref<128x512xbf16, #tpu.memory_space<vmem>>) attributes {dimension_semantics = [#tpu.dimension_semantics<parallel>, #tpu.dimension_semantics<arbitrary>], iteration_bounds = array<i64: 2, 8>, scalar_prefetch = 0 : i64, scratch_operands = 1 : i64, tpu.core_type = #tpu.core_type<tc>, window_params = [{transform_indices = @transform_0, window_bounds = array<i64: 128, 512>}, {pipeline_mode = #tpu.pipeline_mode<synchronous>, transform_indices = @transform_1, window_bounds = array<i64: 1, 512>}, {transform_indices = @transform_2, window_bounds = array<i64: 512, 128>}, {transform_indices = @transform_3, window_bounds = array<i64: 128, 128>}]} {
    %c0_i32 = arith.constant 0 : i32
    %0 = arith.cmpi eq, %arg1, %c0_i32 : i32
    %1 = arith.extui %0 : i1 to i32
    %c0_i32_0 = arith.constant 0 : i32
    %2 = arith.cmpi ne, %1, %c0_i32_0 : i32
    scf.if %2 {
      %c0_6 = arith.constant 0 : index
      %c0_7 = arith.constant 0 : index
      %8 = vector.load %arg2[%c0_6, %c0_7] : memref<128x512xf32, #tpu.memory_space<vmem>>, vector<128x512xf32>
      %9 = arith.mulf %8, %8 : vector<128x512xf32>
      %cst_8 = arith.constant dense<0.000000e+00> : vector<128xf32>
      %10 = vector.multi_reduction <add>, %9, %cst_8 [1] : vector<128x512xf32> to vector<128xf32>
      %11 = vector.shape_cast %10 : vector<128xf32> to vector<128x1xf32>
      %cst_9 = arith.constant 5.120000e+02 : f32
      %12 = vector.broadcast %cst_9 : f32 to vector<128x1xf32>
      %13 = arith.divf %11, %12 : vector<128x1xf32>
      %cst_10 = arith.constant 9.99999997E-7 : f32
      %14 = vector.broadcast %cst_10 : f32 to vector<128x1xf32>
      %15 = arith.addf %13, %14 : vector<128x1xf32>
      %16 = math.rsqrt %15 : vector<128x1xf32>
      %17 = vector.broadcast %16 : vector<128x1xf32> to vector<128x512xf32>
      %18 = arith.mulf %8, %17 : vector<128x512xf32>
      %c0_11 = arith.constant 0 : index
      %c0_12 = arith.constant 0 : index
      %19 = vector.load %arg3[%c0_11, %c0_12] : memref<1x512xf32, #tpu.memory_space<vmem>>, vector<1x512xf32>
      %20 = vector.broadcast %19 : vector<1x512xf32> to vector<128x512xf32>
      %21 = arith.mulf %18, %20 : vector<128x512xf32>
      %22 = arith.truncf %21 : vector<128x512xf32> to vector<128x512xbf16>
      %c0_13 = arith.constant 0 : index
      %c0_14 = arith.constant 0 : index
      %23 = vector.load %arg6[%c0_13, %c0_14] : memref<128x512xbf16, #tpu.memory_space<vmem>>, vector<128x512xbf16>
      tpu.vector_store %arg6[%c0_13, %c0_14], %22 {strides = array<i32>} : memref<128x512xbf16, #tpu.memory_space<vmem>>, vector<128x512xbf16>,
    } else {
    }
    %c0 = arith.constant 0 : index
    %c0_1 = arith.constant 0 : index
    %3 = vector.load %arg6[%c0, %c0_1] : memref<128x512xbf16, #tpu.memory_space<vmem>>, vector<128x512xbf16>
    %c0_2 = arith.constant 0 : index
    %c0_3 = arith.constant 0 : index
    %4 = vector.load %arg4[%c0_2, %c0_3] : memref<512x128xbf16, #tpu.memory_space<vmem>>, vector<512x128xbf16>
    %cst = arith.constant dense<0.000000e+00> : vector<128x128xf32>
    %5 = tpu.matmul %3, %4, %cst {dimension_numbers = #tpu.dot_dimension_numbers<[1], [0], [0], [1], [0, 0, 1, 1], [], []>} : vector<128x512xbf16>, vector<512x128xbf16>, vector<128x128xf32> -> vector<128x128xf32>
    %6 = arith.truncf %5 : vector<128x128xf32> to vector<128x128xbf16>
    %c0_4 = arith.constant 0 : index
    %c0_5 = arith.constant 0 : index
    %7 = vector.load %arg5[%c0_4, %c0_5] : memref<128x128xbf16, #tpu.memory_space<vmem>>, vector<128x128xbf16>
    tpu.vector_store %arg5[%c0_4, %c0_5], %6 {strides = array<i32>} : memref<128x128xbf16, #tpu.memory_space<vmem>>, vector<128x128xbf16>,
    return
  }
  func.func @transform_0(%arg0: i32, %arg1: i32) -> (i32, i32) {
    %c0_i32 = arith.constant 0 : i32
    %c0_i32_0 = arith.constant 0 : i32
    return %arg0, %c0_i32 : i32, i32
  }
  func.func @transform_1(%arg0: i32, %arg1: i32) -> (i32, i32) {
    %c0_i32 = arith.constant 0 : i32
    %c0_i32_0 = arith.constant 0 : i32
    %c0_i32_1 = arith.constant 0 : i32
    return %c0_i32, %c0_i32_0 : i32, i32
  }
  func.func @transform_2(%arg0: i32, %arg1: i32) -> (i32, i32) {
    %c0_i32 = arith.constant 0 : i32
    %c0_i32_0 = arith.constant 0 : i32
    return %c0_i32, %arg1 : i32, i32
  }
  func.func @transform_3(%arg0: i32, %arg1: i32) -> (i32, i32) {
    %c0_i32 = arith.constant 0 : i32
    return %arg0, %arg1 : i32, i32
  }
}

</mosaic_0001>

<bundles_post_ra>
// kernel: tpu_custom_call.1
= control target key start
LH: loop header
LB: loop body
LE: loop exit
PB: predicated region body
PF: predicated region fallthrough
CT: control target
= control target key end

     0   :  { %s3461_s0 = inlined_call_operand.hbm [shape: f32[256,512], index: 0, kind: input, shape index: {}]   ;;  %s3462_s1 = inlined_call_operand.hbm [shape: f32[1,512], index: 1, kind: input, shape index: {}]   ;;  %s3463_s2 = inlined_call_operand.hbm [shape: bf16[512,1024], index: 2, kind: input, shape index: {}]   ;;  %s3464_s3 = inlined_call_operand.hbm [shape: bf16[256,1024], index: 3, kind: output, shape index: {}]  }
   0x1   :  { %3497 = sst [smem:[#allocation42_spill]] %s3461_s0 }
   0x2   :  { %3498 = sst [smem:[#allocation43_spill]] %s3462_s1 }
   0x3   :  { %3499 = sst [smem:[#allocation44_spill]] %s3464_s3 }
   0x4   :  { %8 = vsyncpa [#allocation4], 0 }
   0x5   :  { %10 = vsyncpa [#allocation4 + $0x1], 0 }
   0x6   :  { %11 = vsyncpa [#allocation7], 0 }
   0x7   :  { %12 = vsyncpa [#allocation5], 0 }
   0x8   :  { %14 = vsyncpa [#allocation5 + $0x1], 0  ;;  %s2622_s12 = smov 0   ;;  %s2624_s13 = smov 0  }
   0x9   :  { %s2626_s14 = smov 0   ;;  %s2628_s15 = smov 0  }
   0xa   :  { %s2630_s16 = smov 0   ;;  %s2632_s17 = smov 0  }
   0xb   :  { %s2634_s18 = smov 0   ;;  %s2636_s19 = smov 0  }
   0xc   :  { %s2638_s20 = smov 0   ;;  %s2640_s21 = smov 0  }
   0xd   :  { %s2642_s22 = smov 0   ;;  %s2644_s23 = smov 0  }
   0xe   :  { %s2646_s24 = smov 0   ;;  %s2648_s25 = smov 0  }
   0xf LB: > { %3500 = sst [smem:[#allocation14_spill]] %s2573_s21  ;;  %s29_s26 = sadd.s32 1, %s2581_s23  ;;  %s2589_s25 = sphi %s2648_s25, %s20_s25   ;;  %s2585_s24 = sphi %s2646_s24, %s3580_s24   ;;  %s2581_s23 = sphi %s2644_s23, %s3591_s23   ;;  %s2577_s22 = sphi %s2642_s22, %s3578_s22   ;;  %s2573_s21 = sphi %s2640_s21, %s3590_s21   ;;  %s2569_s20 = sphi %s2638_s20, %s3589_s20   ;;  %s2565_s19 = sphi %s2636_s19, %s3588_s19   ;;  %s2561_s18 = sphi %s2634_s18, %s3587_s18   ;;  %s2557_s17 = sphi %s2632_s17, %s3586_s17   ;;  %s2553_s16 = sphi %s2630_s16, %s3585_s16   ;;  %s2549_s15 = sphi %s2628_s15, %s3584_s15   ;;  %s2545_s14 = sphi %s2626_s14, %s3583_s14   ;;  %s2541_s13 = sphi %s2624_s13, %s3582_s13   ;;  %s2537_s12 = sphi %s2622_s12, %s3581_s12  }
  0x10   : > { %3501 = sst [smem:[#allocation15_spill]] %s2577_s22  ;;  %s32_s27 = sadd.s32 1, %s2585_s24 }
  0x11   : > { %3502 = sst [smem:[#allocation16_spill]] %s2585_s24  ;;  %p30_p0 = scmp.ge.s32.totalorder %s29_s26, 8 }
  0x12   : > { %s39_s28 = sadd.s32 1, %s2569_s20  ;;  %p46_p1 = scmp.ne.s32.totalorder %s2569_s20, %s2565_s19 }
  0x13   : > { %p47_p2 = scmp.eq.s32.totalorder %s2589_s25, 0  ;;  %s3593_s26 = smov (%p30_p0, %s29_s26), 0 }
  0x14   : > { %3503 = sst [smem:[#allocation17_spill]] %s3593_s26  ;;  %s3595_s27 = smov (!%p30_p0, %s32_s27), %s2585_s24 }
  0x15   : > { %p2703_p3 = por %p47_p2, %p46_p1  ;;  %s2709_s30 = ssub.s32 %s2581_s23, %s3593_s26 }
  0x16   : > { %p34_p4 = scmp.ge.s32.totalorder %s3595_s27, 2  ;;  %p84_p5 = scmp.eq.s32.totalorder %s2709_s30, 0 }
  0x17   : > { %p3468_p6 = scmp.lt.s32.totalorder %s2589_s25, 16  ;;  %s162_s4 = sand.u32 1, %s2589_s25  }
  0x18   : > { %s3597_s27 = smov (%p34_p4, %s3595_s27), 0  ;;  %s164_s5 = sand.u32 1, %s2569_s20  }
  0x19   : > { %3505 = sst [smem:[#allocation18_spill]] %s3597_s27  ;;  %s36_s6 = ssub.s32 %s2585_s24, %s3597_s27 }
  0x1a   : > { %p37_p7 = scmp.eq.s32.totalorder %s36_s6, 0  ;;  %s111_s7 = sor.u32 %s2709_s30, %s36_s6 }
  0x1b   : > { %p2720_p8 = scmp.eq.s32.totalorder %s111_s7, 0  ;;  %s1750_s9 = sshll.u32 %s164_s5, 9 }
  0x1c   : > { %s2725_s10 = scalar_select %p37_p7, %s2569_s20, %s39_s28  }
  0x1d   : > { %s1881_s11 = sshll.u32 %s2585_s24, 13  ;;  %s3508_s0 = sld [smem:[#allocation42_spill]] }
  0x1e   : > { %3507 = sst [smem:[#allocation19_spill]] %s2725_s10  ;;  %s166_s21 = scalar_lea.vmem [#allocation3], %s1750_s9 }
  0x1f   : > { %s174_s1 = sshll.u32 %s166_s21, 4  ;;  %p2735_p9 = pnand %p3468_p6, %p2703_p3  ;;  %s175_s1 = int_to_ptr.vmem [resolvable:$true] %s174_s1 }
  0x20   : > { %s2739_s6 = scalar_lea.sflag [#allocation4], %s162_s4  ;;  %s2368_s28 = scalar_lea.vmem %s175_s1, 8192 }
  0x21   : > { %p2357_p10 = pneg %p2735_p9  ;;  %p2369_p11 = scmp.ne.s32.totalorder %s175_s1, %s2368_s28 }
  0x22   : > { %s2591_s3 = smov [#allocation3]  }
  0x23   : > { %s173_s22 = scalar_lea.hbm %s3508_s0, %s1881_s11  ;;  %p2371_p12 = pnand %p2369_p11, %p2357_p10 }
  0x24   : > { %s2373_s26 = sshll.u32 %s2591_s3, 4  ;;  %s2374_s26 = int_to_ptr.vmem [resolvable:$false] %s2373_s26 }
  0x25   : > { %p2372_p13 = pneg %p2371_p12  ;;  %s2375_s21 = scalar_lea.vmem %s2374_s26, 16384 }
  0x26   : > { %p2376_p0 = scmp.lt.s32.totalorder %s175_s1, %s2374_s26  ;;  %p2377_p1 = scmp.lt.s32.totalorder %s2375_s21, %s2368_s28 }
  0x28   : > { %p2378_p4 = por %p2377_p1, %p2376_p0 }
  0x2a   : > { %p2379_p3 = pnand %p2378_p4, %p2372_p13 }
  0x2c   : > { %2382 = shalt.err (!%p2379_p3)
}
  0x2d   : > { %s3469_s29 = smov 512   ;;  %s2593_s4 = smov 32  }
  0x2e   : > { %2123 = dma.hbm_to_vmem [thread:$0]  (!%p2735_p9), %s173_s22, 8192, %s175_s1, %s2739_s6, %s3469_s29, %s3469_s29, %s2593_s4  }
  0x2f   : > { %s2749_s5 = sadd.s32 4294967295, %s2589_s25   ;;  %s1746_s7 = sadd.s32 4294967294, %s2589_s25  }
  0x30   : > { %p52_p7 = scmp.ne.s32.totalorder %s2565_s19, %s2561_s18  ;;  %p3471_p10 = scmp.eq.s32.totalorder %s2749_s5, 0 }
  0x31   : > { %s86_s9 = sadd.s32 1, %s2557_s17  ;;  %p93_p9 = scmp.ne.s32.totalorder %s2557_s17, %s2553_s16 }
  0x32   : > { %s2759_s27 = scalar_select %p84_p5, %s2557_s17, %s86_s9  }
  0x33   : > { %p2763_p11 = por %p3471_p10, %p52_p7  ;;  %p99_p12 = scmp.ne.s32.totalorder %s2553_s16, %s2549_s15 }
  0x34   : > { %s114_s22 = sadd.s32 1, %s2545_s14  ;;  %p2774_p13 = por %p93_p9, %p47_p2 }
  0x35   : > { %s3510_s1 = scalar_select %p2763_p11, 1, 0 }
  0x36   : > { %p124_p0 = scmp.ne.s32.totalorder %s2545_s14, %s2541_s13  ;;  %p2782_p5 = por %p99_p12, %p3471_p10 }
  0x37   : > { %p125_p1 = scmp.eq.s32.totalorder %s2749_s5, 15  ;;  %p130_p2 = scmp.ne.s32.totalorder %s2541_s13, %s2537_s12 }
  0x38   : > { %s3512_s18 = scalar_select %p2782_p5, 1, 0 }
  0x39   : > { %s2790_s30 = scalar_select %p2720_p8, %s2545_s14, %s114_s22  }
  0x3a   : > { %p2792_p4 = por %p125_p1, %p124_p0  ;;  %p131_p3 = scmp.eq.s32.totalorder %s1746_s7, 15 }
  0x3b   : > { %p1747_p7 = scmp.ge.s32.totalorder %s2589_s25, 1  ;;  %p138_p9 = scmp.lt.s32.totalorder %s2589_s25, 17 }
  0x3c   : > { %s3513_s15 = scalar_select %p2792_p4, 1, 0 }
  0x3d   : > { %p2800_p6 = por %p131_p3, %p130_p2  ;;  %p2804_p12 = pnand %p1747_p7, %p138_p9 }
  0x3e   : > { %s2594_s8 = smov [#allocation6]   ;;  %p3516_p8 = scmp.lt.s32.totalorder %s2589_s25, 16 }
  0x3f   : > { %s3514_s28 = scalar_select %p2800_p6, 1, 0 }
  0x40   : > { %s151_s26 = sshll.u32 %s2594_s8, 4  ;;  %p2812_p0 = pnand %p3516_p8, %p2774_p13  ;;  %s152_s26 = int_to_ptr.vmem [resolvable:$true] %s151_s26 }
  0x41   : > { %p2116_p1 = pneg %p2804_p12  ;;  %s186_s4 = sand.u32 1, %s2557_s17  }
  0x42   : > { %s1754_s7 = sshll.u32 %s186_s4, 8  ;;  %s1755_s22 = sshll.u32 %s2581_s23, 6 }
  0x43   : > { %p2821_p2 = pnand %p2116_p1, %p3471_p10  ;;  %s188_s29 = scalar_lea.vmem [#allocation8], %s1754_s7 }
  0x44   : > { %s194_s8 = sshll.u32 %s188_s29, 4  ;;  %s2829_s24 = scalar_lea.hbm %s3463_s2, %s1755_s22  ;;  %s195_s8 = int_to_ptr.vmem [resolvable:$true] %s194_s8 }
  0x45   : > { %p2385_p13 = pneg %p2821_p2  ;;  %s2394_s10 = scalar_lea.vmem %s152_s26, 64 }
  0x46   : > { %p2395_p3 = scmp.ne.s32.totalorder %s152_s26, %s2394_s10  ;;  %p2402_p8 = scmp.lt.s32.totalorder %s152_s26, %s152_s26 }
  0x47   : > { %p2403_p1 = scmp.lt.s32.totalorder %s2394_s10, %s2394_s10 }
  0x48   : > { %p2397_p7 = pnand %p2395_p3, %p2385_p13 }
  0x49   : > { %p2404_p10 = por %p2403_p1, %p2402_p8 }
  0x4a   : > { %p2398_p9 = pneg %p2397_p7 }
  0x4c   : > { %p2405_p6 = pnand %p2404_p10, %p2398_p9 }
  0x4e   : > { %2408 = shalt.err (!%p2405_p6)
}
  0x4f   : > { %s3519_s7 = sld [smem:[#allocation43_spill]]  ;;  %p2411_p4 = pneg %p2812_p0 }
  0x50   : > { %s2422_s0 = scalar_lea.vmem %s195_s8, 4096  ;;  %s2595_s22 = smov [#allocation8]  }
  0x51   : > { %p2423_p5 = scmp.ne.s32.totalorder %s195_s8, %s2422_s0  ;;  %s2427_s11 = sshll.u32 %s2595_s22, 4  ;;  %s2428_s11 = int_to_ptr.vmem [resolvable:$false] %s2427_s11 }
  0x52   : > { %s2429_s10 = scalar_lea.vmem %s2428_s11, 8192  ;;  %p2430_p10 = scmp.lt.s32.totalorder %s195_s8, %s2428_s11 }
  0x53   : > { %p2425_p11 = pnand %p2423_p5, %p2411_p4  ;;  %p2431_p6 = scmp.lt.s32.totalorder %s2429_s10, %s2422_s0 }
  0x55   : > { %2119 = dma.hbm_to_vmem [thread:$0]  (!%p2821_p2), %s3519_s7, 64, %s152_s26, [#allocation7]  }
  0x56   : > { %p2426_p13 = pneg %p2425_p11  ;;  %p2432_p3 = por %p2431_p6, %p2430_p10 }
  0x58   : > { %p2433_p7 = pnand %p2432_p3, %p2426_p13 }
  0x5a   : > { %2436 = shalt.err (!%p2433_p7)
}
  0x5b   : > { %s2596_s9 = smov 64   ;;  %s2597_s26 = smov 4  }
  0x5c   : > { %s3520_s4 = smov 512   ;;  %206 = sbr.rel (%p2804_p12) target bundleno = 656 (0x290), region = 32 }
  0x5d   : > { %2126 = dma.hbm_to_vmem [thread:$0]  (!%p2812_p0), %s2829_s24, 4096, %s195_s8, %s2739_s6, %s3520_s4, %s2596_s9, %s2597_s26  }
  0x5e   : > { %s208_s29 = sand.u32 (!%p2804_p12), 1, %s2749_s5   ;;  %s210_s7 = sand.u32 (!%p2804_p12), 1, %s2565_s19  }
  0x5f   : > { %s1757_s0 = sshll.u32 (!%p2804_p12), %s210_s7, 9  ;;  %s209_s22 = scalar_lea.sflag (!%p2804_p12), [#allocation4], %s208_s29 }
  0x60   : > { %s2849_s11 = scalar_lea.vmem (!%p2804_p12), [#allocation3], %s1757_s0  ;;  %p3521_p11 = scmp.ne.s32.totalorder (!%p2804_p12), %s3510_s1, 0 }
  0x62   : > { %2520 = dma.done.wait (%p3521_p11), %s209_s22, 8192  }
  0x63   : > { %2522 = vsyncadd (%p3521_p11), %s209_s22, 4294959104  ;;  %p3522_p5 = scmp.eq.s32.totalorder %s2749_s5, 0 }
  0x65   : > { %2524 = dma.done.wait (%p3522_p5), [#allocation7], 64   ;;  %p3523_p4 = pmov %p3522_p5 }
  0x66   : > { %s223_s24 = sand.u32 1, %s2553_s16   ;;  %p3524_p12 = scmp.ne.s32.totalorder %s3512_s18, 0 }
  0x67   : > { %2526 = vsyncadd (%p3523_p4), [#allocation7], 4294967232  ;;  %s1759_s6 = sshll.u32 %s223_s24, 8 }
  0x68   : > { %s2860_s3 = scalar_lea.vmem [#allocation8], %s1759_s6 }
  0x69   : > { %2528 = dma.done.wait (%p3524_p12), %s209_s22, 4096  }
  0x6a   : > { %2530 = vsyncadd (%p3524_p12), %s209_s22, 4294963200  ;;  %s250_s1 = sand.u32 1, %s2541_s13   ;;  %s3525_s5 = sld [smem:[#allocation14_spill]] }
  0x6b   : > { %s1760_s21 = sshll.u32 %s250_s1, 6 }
  0x6c   : > { %s2869_s8 = scalar_lea.vmem [#allocation9], %s1760_s21 }
  0x70   : > { %p1761_p0 = scmp.ne.s32.totalorder %s3525_s5, 0 }
  0x72   : > { %259 = sbr.rel (%p1761_p0) target bundleno = 345 (0x159), region = 48 }
  0x77   : > { %v2873_v0 = vld [vmem:[%s2849_s11 + $0x40] sm:$0xff]  ;;  %v2876_v1 = vld [vmem:[%s2849_s11 + $0x48] sm:$0xff]  ;;  %v2879_v2 = vld [vmem:[%s2849_s11 + $0x50] sm:$0xff] }
  0x78   : > { %v2882_v3 = vld [vmem:[%s2849_s11 + $0x58] sm:$0xff]  ;;  %v332_v4 = vmul.f32 %v2873_v0, %v2873_v0  ;;  %v333_v5 = vmul.f32 %v2876_v1, %v2876_v1  ;;  %v334_v6 = vmul.f32 %v2879_v2, %v2879_v2  ;;  %v2891_v7 = vld [vmem:[%s2849_s11] sm:$0xff]  ;;  %v2894_v8 = vld [vmem:[%s2849_s11 + $0x8] sm:$0xff] }
  0x79   : > { %v335_v9 = vmul.f32 %v2882_v3, %v2882_v3  ;;  %v2899_v10 = vld [vmem:[%s2849_s11 + $0x10] sm:$0xff]  ;;  %v2902_v11 = vld [vmem:[%s2849_s11 + $0x18] sm:$0xff]  ;;  %v324_v12 = vmul.f32 %v2891_v7, %v2891_v7  ;;  %v325_v13 = vmul.f32 %v2894_v8, %v2894_v8  ;;  %v2909_v14 = vld [vmem:[%s2849_s11 + $0x60] sm:$0xff] }
  0x7a   : > { %v398_v15 = vadd.f32 %v333_v5, %v332_v4  ;;  %v326_v16 = vmul.f32 %v2899_v10, %v2899_v10  ;;  %v327_v17 = vmul.f32 %v2902_v11, %v2902_v11  ;;  %v2916_v18 = vld [vmem:[%s2849_s11 + $0x68] sm:$0xff]  ;;  %v2919_v19 = vld [vmem:[%s2849_s11 + $0x70] sm:$0xff]  ;;  %v2922_v20 = vld [vmem:[%s2849_s11 + $0x78] sm:$0xff]  ;;  %v336_v21 = vmul.f32 %v2909_v14, %v2909_v14 }
  0x7b   : > { %v388_v22 = vadd.f32 %v325_v13, %v324_v12  ;;  %v337_v23 = vmul.f32 %v2916_v18, %v2916_v18  ;;  %v338_v24 = vmul.f32 %v2919_v19, %v2919_v19  ;;  %v339_v25 = vmul.f32 %v2922_v20, %v2922_v20  ;;  %v2933_v26 = vld [vmem:[%s2849_s11 + $0x20] sm:$0xff]  ;;  %v2936_v27 = vld [vmem:[%s2849_s11 + $0x28] sm:$0xff]  ;;  %v2939_v28 = vld [vmem:[%s2849_s11 + $0x30] sm:$0xff] }
  0x7c   : > { %v399_v29 = vadd.f32 %v398_v15, %v334_v6  ;;  %v2942_v30 = vld [vmem:[%s2849_s11 + $0x38] sm:$0xff]  ;;  %v328_v31 = vmul.f32 %v2933_v26, %v2933_v26  ;;  %v329_v32 = vmul.f32 %v2936_v27, %v2936_v27  ;;  %v330_v33 = vmul.f32 %v2939_v28, %v2939_v28  ;;  %v2951_v34 = vld [vmem:[%s2849_s11 + $0xa0] sm:$0xff]  ;;  %v2954_v35 = vld [vmem:[%s2849_s11 + $0xa8] sm:$0xff] }
  0x7d   : > { %v389_v36 = vadd.f32 %v388_v22, %v326_v16  ;;  %v403_v37 = vadd.f32 %v337_v23, %v336_v21  ;;  %v331_v38 = vmul.f32 %v2942_v30, %v2942_v30  ;;  %v2959_v39 = vld [vmem:[%s2849_s11 + $0xb0] sm:$0xff]  ;;  %v2962_v40 = vld [vmem:[%s2849_s11 + $0xb8] sm:$0xff]  ;;  %v344_v41 = vmul.f32 %v2951_v34, %v2951_v34  ;;  %v2967_v42 = vld [vmem:[%s2849_s11 + $0x80] sm:$0xff] }
  0x7e   : > { %v400_v43 = vadd.f32 %v399_v29, %v335_v9  ;;  %v393_v44 = vadd.f32 %v329_v32, %v328_v31  ;;  %v345_v45 = vmul.f32 %v2954_v35, %v2954_v35  ;;  %v346_v46 = vmul.f32 %v2959_v39, %v2959_v39  ;;  %v2974_v47 = vld [vmem:[%s2849_s11 + $0x88] sm:$0xff]  ;;  %v2977_v48 = vld [vmem:[%s2849_s11 + $0x90] sm:$0xff]  ;;  %v2980_v49 = vld [vmem:[%s2849_s11 + $0x98] sm:$0xff] }
  0x7f   : > { %v390_v50 = vadd.f32 %v389_v36, %v327_v17  ;;  %v404_v51 = vadd.f32 %v403_v37, %v338_v24  ;;  %v347_v52 = vmul.f32 %v2962_v40, %v2962_v40  ;;  %v340_v53 = vmul.f32 %v2967_v42, %v2967_v42  ;;  %v2987_v54 = vld [vmem:[%s2849_s11 + $0xe0] sm:$0xff]  ;;  %v2990_v55 = vld [vmem:[%s2849_s11 + $0xe8] sm:$0xff]  ;;  %v2993_v56 = vld [vmem:[%s2849_s11 + $0xf0] sm:$0xff] }
  0x80   : > { %401 = vadd.xlane.f32.xlu1 %v400_v43  ;;  %v394_v57 = vadd.f32 %v393_v44, %v330_v33  ;;  %v413_v58 = vadd.f32 %v345_v45, %v344_v41  ;;  %v341_v59 = vmul.f32 %v2974_v47, %v2974_v47  ;;  %v342_v60 = vmul.f32 %v2977_v48, %v2977_v48  ;;  %v3000_v61 = vld [vmem:[%s2849_s11 + $0xf8] sm:$0xff]  ;;  %v3003_v62 = vld [vmem:[%s2849_s11 + $0xc0] sm:$0xff]  ;;  %v3006_v63 = vld [vmem:[%s2849_s11 + $0xc8] sm:$0xff] }
  0x81   : > { %391 = vadd.xlane.f32.xlu0 %v390_v50  ;;  %v405_v4 = vadd.f32 %v404_v51, %v339_v25  ;;  %v343_v5 = vmul.f32 %v2980_v49, %v2980_v49  ;;  %v352_v6 = vmul.f32 %v2987_v54, %v2987_v54  ;;  %v353_v9 = vmul.f32 %v2990_v55, %v2990_v55  ;;  %v3015_v12 = vld [vmem:[%s2849_s11 + $0xd0] sm:$0xff]  ;;  %v3018_v13 = vld [vmem:[%s2849_s11 + $0xd8] sm:$0xff]  ;;  %v3023_v22 = vld [vmem:[%s2849_s11 + $0x120] sm:$0xff] }
  0x82   : > { %v395_v15 = vadd.f32 %v394_v57, %v331_v38  ;;  %v414_v16 = vadd.f32 %v413_v58, %v346_v46  ;;  %v408_v17 = vadd.f32 %v341_v59, %v340_v53  ;;  %v354_v21 = vmul.f32 %v2993_v56, %v2993_v56  ;;  %v3026_v23 = vld [vmem:[%s2849_s11 + $0x128] sm:$0xff]  ;;  %v3035_v32 = vld [vmem:[%s2849_s11 + $0x130] sm:$0xff]  ;;  %v3038_v33 = vld [vmem:[%s2849_s11 + $0x138] sm:$0xff] }
  0x83   : > { %v355_v24 = vmul.f32 %v3000_v61, %v3000_v61  ;;  %v423_v25 = vadd.f32 %v353_v9, %v352_v6  ;;  %v348_v29 = vmul.f32 %v3003_v62, %v3003_v62  ;;  %v349_v31 = vmul.f32 %v3006_v63, %v3006_v63  ;;  %v3041_v36 = vld [vmem:[%s2849_s11 + $0x100] sm:$0xff]  ;;  %v3048_v44 = vld [vmem:[%s2849_s11 + $0x108] sm:$0xff]  ;;  %v3051_v45 = vld [vmem:[%s2849_s11 + $0x110] sm:$0xff] }
  0x84   : > { %406 = vadd.xlane.f32.xlu1 %v405_v4  ;;  %v415_v37 = vadd.f32 %v414_v16, %v347_v52  ;;  %v409_v38 = vadd.f32 %v408_v17, %v342_v60  ;;  %v350_v41 = vmul.f32 %v3015_v12, %v3015_v12  ;;  %v351_v43 = vmul.f32 %v3018_v13, %v3018_v13  ;;  %v3058_v53 = vld [vmem:[%s2849_s11 + $0x118] sm:$0xff]  ;;  %v3061_v57 = vld [vmem:[%s2849_s11 + $0x160] sm:$0xff]  ;;  %v3064_v58 = vld [vmem:[%s2849_s11 + $0x168] sm:$0xff] }
  0x85   : > { %3526 = vst [vmem:[#allocation20_spill] sm:$0xff] %v3048_v44  ;;  %3527 = vst [vmem:[#allocation21_spill] sm:$0xff] %v3051_v45  ;;  %396 = vadd.xlane.f32.xlu0 %v395_v15  ;;  %v424_v46 = vadd.f32 %v423_v25, %v354_v21  ;;  %v418_v50 = vadd.f32 %v349_v31, %v348_v29  ;;  %v360_v51 = vmul.f32 %v3023_v22, %v3023_v22  ;;  %v3073_v9 = vld [vmem:[%s2849_s11 + $0x170] sm:$0xff]  ;;  %v3081_v25 = vld [vmem:[%s2849_s11 + $0x148] sm:$0xff] }
  0x86   : > { %v361_v52 = vmul.f32 %v3026_v23, %v3026_v23  ;;  %3528 = vst [vmem:[#allocation22_spill] sm:$0xff] %v3058_v53  ;;  %3529 = vst [vmem:[#allocation23_spill] sm:$0xff] %v3061_v57  ;;  %v410_v59 = vadd.f32 %v409_v38, %v343_v5  ;;  %v362_v60 = vmul.f32 %v3035_v32, %v3035_v32  ;;  %v3078_v5 = vld [vmem:[%s2849_s11 + $0x140] sm:$0xff] }
  0x87   : > { %3530 = vst [vmem:[#allocation24_spill] sm:$0xff] %v3064_v58  ;;  %v363_v4 = vmul.f32 %v3038_v33, %v3038_v33  ;;  %v356_v6 = vmul.f32 %v3041_v36, %v3041_v36  ;;  %3531 = vst [vmem:[#allocation25_spill] sm:$0xff] %v3073_v9  ;;  %v425_v15 = vadd.f32 %v424_v46, %v355_v24  ;;  %v3088_v24 = vld [vmem:[%s2849_s11 + $0x178] sm:$0xff]  ;;  %v3095_v46 = vld [vmem:[%s2849_s11 + $0x150] sm:$0xff] }
  0x88   : > { %v419_v16 = vadd.f32 %v418_v50, %v350_v41  ;;  %v433_v17 = vadd.f32 %v361_v52, %v360_v51  ;;  %v357_v21 = vmul.f32 %v3048_v44, %v3048_v44  ;;  %3532 = vst [vmem:[#allocation26_spill] sm:$0xff] %v3078_v5  ;;  %3533 = vst [vmem:[#allocation27_spill] sm:$0xff] %v3081_v25  ;;  %416 = vadd.xlane.f32.xlu1 %v415_v37 }
  0x89   : > { %v358_v29 = vmul.f32 %v3051_v45, %v3051_v45  ;;  %v359_v31 = vmul.f32 %v3058_v53, %v3058_v53  ;;  %3534 = vst [vmem:[#allocation28_spill] sm:$0xff] %v3088_v24  ;;  %v368_v38 = vmul.f32 %v3061_v57, %v3061_v57  ;;  %v369_v41 = vmul.f32 %v3064_v58, %v3064_v58  ;;  %v3100_v53 = vld [vmem:[%s2849_s11 + $0x1a0] sm:$0xff]  ;;  %v3103_v45 = vld [vmem:[%s2849_s11 + $0x1a8] sm:$0xff]  ;;  %v3106_v57 = vld [vmem:[%s2849_s11 + $0x158] sm:$0xff] }
  0x8a   : > { %3535 = vst [vmem:[#allocation29_spill] sm:$0xff] %v3095_v46  ;;  %411 = vadd.xlane.f32.xlu0 %v410_v59  ;;  %v420_v37 = vadd.f32 %v419_v16, %v351_v43  ;;  %v434_v50 = vadd.f32 %v433_v17, %v362_v60  ;;  %v428_v51 = vadd.f32 %v357_v21, %v356_v6  ;;  %3536 = vst [vmem:[#allocation30_spill] sm:$0xff] %v3100_v53  ;;  %v3113_v59 = vld [vmem:[%s2849_s11 + $0x1b0] sm:$0xff]  ;;  %v3116_v60 = vld [vmem:[%s2849_s11 + $0x180] sm:$0xff] }
  0x8b   : > { %v370_v52 = vmul.f32 %v3073_v9, %v3073_v9  ;;  %3537 = vst [vmem:[#allocation31_spill] sm:$0xff] %v3103_v45  ;;  %v443_v44 = vadd.f32 %v369_v41, %v368_v38  ;;  %3538 = vst [vmem:[#allocation32_spill] sm:$0xff] %v3106_v57  ;;  %v364_v58 = vmul.f32 %v3078_v5, %v3078_v5  ;;  %v3123_v38 = vld [vmem:[%s2849_s11 + $0x1b8] sm:$0xff]  ;;  %v3126_v41 = vld [vmem:[%s2849_s11 + $0x188] sm:$0xff] }
  0x8c   : > { %v365_v43 = vmul.f32 %v3081_v25, %v3081_v25  ;;  %3539 = vst [vmem:[#allocation33_spill] sm:$0xff] %v3113_v59  ;;  %3540 = vst [vmem:[#allocation34_spill] sm:$0xff] %v3116_v60  ;;  %v435_v6 = vadd.f32 %v434_v50, %v363_v4  ;;  %v429_v16 = vadd.f32 %v428_v51, %v358_v29  ;;  %426 = vadd.xlane.f32.xlu1 %v425_v15  ;;  %v3133_v29 = vld [vmem:[%s2849_s11 + $0x190] sm:$0xff]  ;;  %v3136_v50 = vld [vmem:[%s2849_s11 + $0x1e0] sm:$0xff] }
  0x8d   : > { %v371_v17 = vmul.f32 %v3088_v24, %v3088_v24  ;;  %v366_v21 = vmul.f32 %v3095_v46, %v3095_v46  ;;  %3541 = vst [vmem:[#allocation35_spill] sm:$0xff] %v3123_v38  ;;  %3542 = vst [vmem:[#allocation36_spill] sm:$0xff] %v3126_v41  ;;  %v444_v25 = vadd.f32 %v443_v44, %v370_v52  ;;  %v3139_v51 = vld [vmem:[%s2849_s11 + $0x1e8] sm:$0xff]  ;;  %v3146_v15 = vld [vmem:[%s2849_s11 + $0x198] sm:$0xff] }
  0x8e   : > { %v438_v5 = vadd.f32 %v365_v43, %v364_v58  ;;  %v376_v9 = vmul.f32 %v3100_v53, %v3100_v53  ;;  %v377_v4 = vmul.f32 %v3103_v45, %v3103_v45  ;;  %3543 = vst [vmem:[#allocation37_spill] sm:$0xff] %v3133_v29  ;;  %3544 = vst [vmem:[#allocation38_spill] sm:$0xff] %v3136_v50  ;;  %421 = vadd.xlane.f32.xlu0 %v420_v37  ;;  %v3151_v43 = vld [vmem:[%s2849_s11 + $0x1f0] sm:$0xff] }
  0x8f   : > { %3545 = vst [vmem:[#allocation39_spill] sm:$0xff] %v3139_v51  ;;  %v430_v46 = vadd.f32 %v429_v16, %v359_v31  ;;  %v367_v44 = vmul.f32 %v3106_v57, %v3106_v57  ;;  %v378_v58 = vmul.f32 %v3113_v59, %v3113_v59  ;;  %v372_v52 = vmul.f32 %v3116_v60, %v3116_v60  ;;  %v3158_v16 = vld [vmem:[%s2849_s11 + $0x1c0] sm:$0xff]  ;;  %v3161_v57 = vld [vmem:[%s2849_s11 + $0x1c8] sm:$0xff] }
  0x90   : > { %v439_v45 = vadd.f32 %v438_v5, %v366_v21  ;;  %v379_v53 = vmul.f32 %v3123_v38, %v3123_v38  ;;  %v453_v37 = vadd.f32 %v377_v4, %v376_v9  ;;  %v373_v31 = vmul.f32 %v3126_v41, %v3126_v41  ;;  %3546 = vst [vmem:[#allocation40_spill] sm:$0xff] %v3161_v57  ;;  %v3170_v9 = vld [vmem:[%s2849_s11 + $0x1d0] sm:$0xff] }
  0x91   : > { %v445_v59 = vadd.f32 %v444_v25, %v371_v17  ;;  %v374_v24 = vmul.f32 %v3133_v29, %v3133_v29  ;;  %v384_v5 = vmul.f32 %v3136_v50, %v3136_v50  ;;  %v385_v21 = vmul.f32 %v3139_v51, %v3139_v51  ;;  %3547 = vst [vmem:[#allocation41_spill] sm:$0xff] %v3170_v9  ;;  %v3177_v29 = vld [vmem:[%s2849_s11 + $0x1f8] sm:$0xff] }
  0x92   : > { %436 = vadd.xlane.f32.xlu1 %v435_v6  ;;  %v454_v4 = vadd.f32 %v453_v37, %v378_v58  ;;  %v375_v41 = vmul.f32 %v3146_v15, %v3146_v15  ;;  %v448_v60 = vadd.f32 %v373_v31, %v372_v52  ;;  %v386_v25 = vmul.f32 %v3151_v43, %v3151_v43  ;;  %v3184_v58 = vld [vmem:[%s2849_s11 + $0x1d8] sm:$0xff] }
  0x93   : > { %431 = vadd.xlane.f32.xlu0 %v430_v46  ;;  %v440_v17 = vadd.f32 %v439_v45, %v367_v44  ;;  %v463_v38 = vadd.f32 %v385_v21, %v384_v5  ;;  %v380_v50 = vmul.f32 %v3158_v16, %v3158_v16  ;;  %v381_v51 = vmul.f32 %v3161_v57, %v3161_v57 }
  0x94   : > { %v449_v6 = vadd.f32 %v448_v60, %v374_v24  ;;  %v382_v52 = vmul.f32 %v3170_v9, %v3170_v9  ;;  %v455_v31 = vadd.f32 %v454_v4, %v379_v53  ;;  %v387_v45 = vmul.f32 %v3177_v29, %v3177_v29 }
  0x95   : > { %v458_v37 = vadd.f32 %v381_v51, %v380_v50  ;;  %v464_v46 = vadd.f32 %v463_v38, %v386_v25  ;;  %v383_v5 = vmul.f32 %v3184_v58, %v3184_v58  ;;  %v583_v4 = vlaneseq }
  0x96   : > { %446 = vadd.xlane.f32.xlu1 %v445_v59  ;;  %v450_v44 = vadd.f32 %v449_v6, %v375_v41 }
  0x97   : > { %441 = vadd.xlane.f32.xlu0 %v440_v17  ;;  %v459_v21 = vadd.f32 %v458_v37, %v382_v52  ;;  %v465_v24 = vadd.f32 %v464_v46, %v387_v45  ;;  %v584_v52 = vshrl.u32 %v583_v4, 7 }
  0x99   : > { %v460_v60 = vadd.f32 %v459_v21, %v383_v5  ;;  %v585_v5 = vsub.s32 0, %v584_v52  ;;  %v589_v21 = vsub.s32 1, %v584_v52 }
  0x9a   : > { %456 = vadd.xlane.f32.xlu1 %v455_v31 }
  0x9b   : > { %451 = vadd.xlane.f32.xlu0 %v450_v44 }
  0x9e   : > { %466 = vadd.xlane.f32.xlu1 %v465_v24 }
  0x9f   : > { %461 = vadd.xlane.f32.xlu0 %v460_v60 }
 0x109   : > { %v402_v9 = vpop.xlane.xlu1 %401 }
 0x10a   : > { %v471_v50 = vmul.f32 0.001953125, %v402_v9  ;;  %v392_v59 = vpop.xlane.xlu0 %391 }
 0x10b   : > { %v469_v53 = vmul.f32 0.001953125, %v392_v59  ;;  %v593_v59 = vsub.s32 2, %v584_v52 }
 0x10c   : > { %v487_v51 = vadd.f32 1e-06, %v471_v50  ;;  %v581_v50 = vld [vmem:[#allocation6] sm:$0xf] }
 0x10d   : > { %v485_v57 = vadd.f32 1e-06, %v469_v53  ;;  %v407_v38 = vpop.xlane.xlu1 %406  ;;  %v597_v53 = vsub.s32 3, %v584_v52 }
 0x10e   : > { %2255 = vrsqrt.f32 %v487_v51  ;;  %v472_v41 = vmul.f32 0.001953125, %v407_v38  ;;  %v397_v25 = vpop.xlane.xlu0 %396 }
 0x10f   : > { %2257 = vrsqrt.f32 %v485_v57  ;;  %v470_v17 = vmul.f32 0.001953125, %v397_v25 }
 0x110   : > { %v488_v6 = vadd.f32 1e-06, %v472_v41  ;;  %v3192_v41 = vrot.slane %v581_v50, %v585_v5 }
 0x111   : > { %v486_v37 = vadd.f32 1e-06, %v470_v17  ;;  %v417_v31 = vpop.xlane.xlu1 %416 }
 0x112   : > { %2259 = vrsqrt.f32 %v488_v6  ;;  %v474_v45 = vmul.f32 0.001953125, %v417_v31  ;;  %v3194_v6 = vrot.slane %v581_v50, %v589_v21  ;;  %v3198_v31 = vrot.slane %v581_v50, %v597_v53 }
 0x113   : > { %v412_v46 = vpop.xlane.xlu0 %411  ;;  %2261 = vrsqrt.f32 %v486_v37  ;;  %v3196_v37 = vrot.slane %v581_v50, %v593_v59 }
 0x114   : > { %v473_v9 = vmul.f32 0.001953125, %v412_v46  ;;  %v490_v44 = vadd.f32 1e-06, %v474_v45 }
 0x115   : > { %v427_v60 = vpop.xlane.xlu1 %426 }
 0x116   : > { %v489_v24 = vadd.f32 1e-06, %v473_v9  ;;  %2263 = vrsqrt.f32 %v490_v44  ;;  %v476_v57 = vmul.f32 0.001953125, %v427_v60 }
 0x117   : > { %v422_v51 = vpop.xlane.xlu0 %421 }
 0x118   : > { %2265 = vrsqrt.f32 %v489_v24  ;;  %v475_v4 = vmul.f32 0.001953125, %v422_v51  ;;  %v492_v38 = vadd.f32 1e-06, %v476_v57 }
 0x11a   : > { %v491_v25 = vadd.f32 1e-06, %v475_v4  ;;  %2267 = vrsqrt.f32 %v492_v38 }
 0x11b   : > { %v437_v17 = vpop.xlane.xlu1 %436  ;;  %v2256_v46 = vpop.eup %2255 }
 0x11c   : > { %v432_v45 = vpop.xlane.xlu0 %431  ;;  %2269 = vrsqrt.f32 %v491_v25  ;;  %v3200_v52 = vmul.f32 0.001953125, %v437_v17  ;;  %v2258_v44 = vpop.eup %2257  ;;  %v525_v5 = vmul.f32 %v2256_v46, %v2873_v0  ;;  %v526_v24 = vmul.f32 %v2256_v46, %v2876_v1 }
 0x11d   : > { %v3202_v9 = vmul.f32 0.001953125, %v432_v45  ;;  %v527_v21 = vmul.f32 %v2256_v46, %v2879_v2  ;;  %v528_v60 = vmul.f32 %v2256_v46, %v2882_v3  ;;  %v517_v50 = vmul.f32 %v2258_v44, %v2891_v7 }
 0x11e   : > { %v518_v59 = vmul.f32 %v2258_v44, %v2894_v8  ;;  %v519_v53 = vmul.f32 %v2258_v44, %v2899_v10  ;;  %v520_v57 = vmul.f32 %v2258_v44, %v2902_v11  ;;  %v611_v51 = vmul.f32 %v3192_v41, %v525_v5 }
 0x11f   : > { %v612_v4 = vmul.f32 %v3194_v6, %v526_v24  ;;  %v613_v0 = vmul.f32 %v3196_v37, %v527_v21  ;;  %v614_v1 = vmul.f32 %v3198_v31, %v528_v60  ;;  %v2260_v38 = vpop.eup %2259  ;;  %v603_v2 = vmul.f32 %v3192_v41, %v517_v50 }
 0x120   : > { %v604_v3 = vmul.f32 %v3194_v6, %v518_v59  ;;  %v605_v7 = vmul.f32 %v3196_v37, %v519_v53  ;;  %v606_v8 = vmul.f32 %v3198_v31, %v520_v57  ;;  %v2262_v10 = vpop.eup %2261  ;;  %v529_v17 = vmul.f32 %v2260_v38, %v2909_v14 }
 0x121   : > { %v1886_v25 = vpack.c.bf16 %v612_v4, %v611_v51  ;;  %v1887_v11 = vpack.c.bf16 %v614_v1, %v613_v0  ;;  %v530_v45 = vmul.f32 %v2260_v38, %v2916_v18  ;;  %v531_v5 = vmul.f32 %v2260_v38, %v2919_v19 }
 0x122   : > { %v1882_v46 = vpack.c.bf16 %v604_v3, %v603_v2  ;;  %v1883_v44 = vpack.c.bf16 %v606_v8, %v605_v7  ;;  %v532_v24 = vmul.f32 %v2260_v38, %v2922_v20  ;;  %v615_v21 = vmul.f32 %v3192_v41, %v529_v17 }
 0x123   : > { %863 = vst [vmem:[#allocation2 + $0x50] sm:$0xff] %v1886_v25  ;;  %864 = vst [vmem:[#allocation2 + $0x68] sm:$0xff] %v1887_v11  ;;  %v616_v60 = vmul.f32 %v3194_v6, %v530_v45  ;;  %v521_v50 = vmul.f32 %v2262_v10, %v2933_v26  ;;  %v522_v59 = vmul.f32 %v2262_v10, %v2936_v27  ;;  %v2264_v53 = vpop.eup %2263  ;;  %v447_v27 = vpop.xlane.xlu1 %446 }
 0x124   : > { %859 = vst [vmem:[#allocation2 + $0xb0] sm:$0xff] %v1882_v46  ;;  %860 = vst [vmem:[#allocation2] sm:$0xff] %v1883_v44  ;;  %v617_v14 = vmul.f32 %v3196_v37, %v531_v5  ;;  %v618_v18 = vmul.f32 %v3198_v31, %v532_v24  ;;  %v523_v19 = vmul.f32 %v2262_v10, %v2939_v28 }
 0x125   : > { %v524_v20 = vmul.f32 %v2262_v10, %v2942_v30  ;;  %v2266_v57 = vpop.eup %2265  ;;  %v1888_v51 = vpack.c.bf16 %v616_v60, %v615_v21  ;;  %v607_v4 = vmul.f32 %v3192_v41, %v521_v50  ;;  %v608_v0 = vmul.f32 %v3194_v6, %v522_v59  ;;  %v442_v10 = vpop.xlane.xlu0 %441 }
 0x126   : > { %v537_v26 = vmul.f32 %v2264_v53, %v2951_v34  ;;  %v1889_v1 = vpack.c.bf16 %v618_v18, %v617_v14  ;;  %v609_v38 = vmul.f32 %v3196_v37, %v523_v19  ;;  %v538_v3 = vmul.f32 %v2264_v53, %v2954_v35 }
 0x127   : > { %v610_v2 = vmul.f32 %v3198_v31, %v524_v20  ;;  %865 = vst [vmem:[#allocation2 + $0x30] sm:$0xff] %v1888_v51  ;;  %v1884_v28 = vpack.c.bf16 %v608_v0, %v607_v4  ;;  %v539_v30 = vmul.f32 %v2264_v53, %v2959_v39  ;;  %v540_v7 = vmul.f32 %v2264_v53, %v2962_v40  ;;  %v2268_v25 = vpop.eup %2267  ;;  %v457_v53 = vpop.xlane.xlu1 %456 }
 0x128   : > { %v623_v8 = vmul.f32 %v3192_v41, %v537_v26  ;;  %866 = vst [vmem:[#allocation2 + $0x48] sm:$0xff] %v1889_v1  ;;  %v624_v11 = vmul.f32 %v3194_v6, %v538_v3  ;;  %v533_v17 = vmul.f32 %v2266_v57, %v2967_v42  ;;  %v534_v45 = vmul.f32 %v2266_v57, %v2974_v47 }
 0x129   : > { %v1885_v34 = vpack.c.bf16 %v610_v2, %v609_v38  ;;  %v2270_v46 = vpop.eup %2269  ;;  %861 = vst [vmem:[#allocation2 + $0xd8] sm:$0xff] %v1884_v28  ;;  %v625_v35 = vmul.f32 %v3196_v37, %v539_v30  ;;  %v626_v39 = vmul.f32 %v3198_v31, %v540_v7  ;;  %v535_v40 = vmul.f32 %v2266_v57, %v2977_v48  ;;  %v452_v51 = vpop.xlane.xlu0 %451 }
 0x12a   : > { %v536_v44 = vmul.f32 %v2266_v57, %v2980_v49  ;;  %v1892_v5 = vpack.c.bf16 %v624_v11, %v623_v8  ;;  %v619_v24 = vmul.f32 %v3192_v41, %v533_v17  ;;  %v620_v21 = vmul.f32 %v3194_v6, %v534_v45 }
 0x12b   : > { %862 = vst [vmem:[#allocation2 + $0x18] sm:$0xff] %v1885_v34  ;;  %v545_v42 = vmul.f32 %v2268_v25, %v2987_v54  ;;  %v1893_v60 = vpack.c.bf16 %v626_v39, %v625_v35  ;;  %v621_v47 = vmul.f32 %v3196_v37, %v535_v40  ;;  %v546_v59 = vmul.f32 %v2268_v25, %v2990_v55  ;;  %v467_v30 = vpop.xlane.xlu1 %466 }
 0x12c   : > { %v622_v50 = vmul.f32 %v3198_v31, %v536_v44  ;;  %869 = vst [vmem:[#allocation2 + $0xe8] sm:$0xff] %v1892_v5  ;;  %v1890_v48 = vpack.c.bf16 %v620_v21, %v619_v24  ;;  %v547_v49 = vmul.f32 %v2268_v25, %v2993_v56  ;;  %v548_v14 = vmul.f32 %v2268_v25, %v3000_v61 }
 0x12d   : > { %v631_v18 = vmul.f32 %v3192_v41, %v545_v42  ;;  %870 = vst [vmem:[#allocation2 + $0xb8] sm:$0xff] %v1893_v60  ;;  %v632_v54 = vmul.f32 %v3194_v6, %v546_v59  ;;  %v541_v20 = vmul.f32 %v2270_v46, %v3003_v62  ;;  %v542_v57 = vmul.f32 %v2270_v46, %v3006_v63  ;;  %v462_v11 = vpop.xlane.xlu0 %461  ;;  %v3548_v42 = vld [vmem:[#allocation20_spill] sm:$0xff]  ;;  %v3550_v59 = vld [vmem:[#allocation22_spill] sm:$0xff] }
 0x12e   : > { %v1891_v19 = vpack.c.bf16 %v622_v50, %v621_v47  ;;  %867 = vst [vmem:[#allocation2 + $0x80] sm:$0xff] %v1890_v48  ;;  %v633_v55 = vmul.f32 %v3196_v37, %v547_v49  ;;  %v634_v4 = vmul.f32 %v3198_v31, %v548_v14  ;;  %v543_v56 = vmul.f32 %v2270_v46, %v3015_v12  ;;  %v3549_v47 = vld [vmem:[#allocation21_spill] sm:$0xff] }
 0x12f   : > { %v544_v61 = vmul.f32 %v2270_v46, %v3018_v13  ;;  %v1896_v0 = vpack.c.bf16 %v632_v54, %v631_v18  ;;  %v627_v26 = vmul.f32 %v3192_v41, %v541_v20  ;;  %v628_v1 = vmul.f32 %v3194_v6, %v542_v57  ;;  %v3551_v57 = vld [vmem:[#allocation23_spill] sm:$0xff] }
 0x130   : > { %868 = vst [vmem:[#allocation2 + $0x88] sm:$0xff] %v1891_v19  ;;  %v494_v62 = vadd.f32 1e-06, %v3200_v52  ;;  %v1897_v38 = vpack.c.bf16 %v634_v4, %v633_v55  ;;  %v629_v63 = vmul.f32 %v3196_v37, %v543_v56  ;;  %v493_v3 = vadd.f32 1e-06, %v3202_v9  ;;  %v3552_v55 = vld [vmem:[#allocation24_spill] sm:$0xff] }
 0x131   : > { %v630_v2 = vmul.f32 %v3198_v31, %v544_v61  ;;  %873 = vst [vmem:[#allocation2 + $0x8] sm:$0xff] %v1896_v0  ;;  %v1894_v28 = vpack.c.bf16 %v628_v1, %v627_v26  ;;  %v480_v12 = vmul.f32 0.001953125, %v447_v27  ;;  %v479_v13 = vmul.f32 0.001953125, %v442_v10  ;;  %v3553_v26 = vld [vmem:[#allocation25_spill] sm:$0xff] }
 0x132   : > { %2271 = vrsqrt.f32 %v494_v62  ;;  %874 = vst [vmem:[#allocation2 + $0x78] sm:$0xff] %v1897_v38  ;;  %v482_v8 = vmul.f32 0.001953125, %v457_v53  ;;  %v481_v25 = vmul.f32 0.001953125, %v452_v51  ;;  %v484_v45 = vmul.f32 0.001953125, %v467_v30  ;;  %v3554_v62 = vld [vmem:[#allocation28_spill] sm:$0xff] }
 0x133   : > { %v1895_v7 = vpack.c.bf16 %v630_v2, %v629_v63  ;;  %2273 = vrsqrt.f32 %v493_v3  ;;  %871 = vst [vmem:[#allocation2 + $0x60] sm:$0xff] %v1894_v28  ;;  %v496_v52 = vadd.f32 1e-06, %v480_v12  ;;  %v495_v34 = vadd.f32 1e-06, %v479_v13  ;;  %v3555_v3 = vld [vmem:[#allocation26_spill] sm:$0xff] }
 0x134   : > { %v498_v17 = vadd.f32 1e-06, %v482_v8  ;;  %v497_v9 = vadd.f32 1e-06, %v481_v25  ;;  %v483_v46 = vmul.f32 0.001953125, %v462_v11  ;;  %v3556_v12 = vld [vmem:[#allocation27_spill] sm:$0xff] }
 0x135   : > { %872 = vst [vmem:[#allocation2 + $0xf0] sm:$0xff] %v1895_v7  ;;  %2275 = vrsqrt.f32 %v496_v52  ;;  %v500_v27 = vadd.f32 1e-06, %v484_v45  ;;  %v3557_v8 = vld [vmem:[#allocation29_spill] sm:$0xff]  ;;  %v3558_v52 = vld [vmem:[#allocation32_spill] sm:$0xff] }
 0x136   : > { %2277 = vrsqrt.f32 %v495_v34  ;;  %v499_v10 = vadd.f32 1e-06, %v483_v46  ;;  %v3559_v46 = vld [vmem:[#allocation30_spill] sm:$0xff] }
 0x137   : > { %2279 = vrsqrt.f32 %v498_v17 }
 0x138   : > { %2281 = vrsqrt.f32 %v497_v9 }
 0x139   : > { %2283 = vrsqrt.f32 %v500_v27 }
 0x13a   : > { %2285 = vrsqrt.f32 %v499_v10 }
 0x13f   : > { %v2272_v35 = vpop.eup %2271 }
 0x140   : > { %v2274_v39 = vpop.eup %2273  ;;  %v553_v40 = vmul.f32 %v2272_v35, %v3023_v22  ;;  %v554_v44 = vmul.f32 %v2272_v35, %v3026_v23  ;;  %v555_v5 = vmul.f32 %v2272_v35, %v3035_v32  ;;  %v556_v24 = vmul.f32 %v2272_v35, %v3038_v33 }
 0x141   : > { %v549_v21 = vmul.f32 %v2274_v39, %v3041_v36  ;;  %v550_v60 = vmul.f32 %v2274_v39, %v3548_v42  ;;  %v551_v50 = vmul.f32 %v2274_v39, %v3549_v47  ;;  %v552_v53 = vmul.f32 %v2274_v39, %v3550_v59 }
 0x142   : > { %v639_v48 = vmul.f32 %v3192_v41, %v553_v40  ;;  %v640_v49 = vmul.f32 %v3194_v6, %v554_v44  ;;  %v641_v22 = vmul.f32 %v3196_v37, %v555_v5  ;;  %v642_v23 = vmul.f32 %v3198_v31, %v556_v24  ;;  %v2276_v14 = vpop.eup %2275  ;;  %v3560_v40 = vld [vmem:[#allocation31_spill] sm:$0xff] }
 0x143   : > { %v635_v32 = vmul.f32 %v3192_v41, %v549_v21  ;;  %v636_v33 = vmul.f32 %v3194_v6, %v550_v60  ;;  %v637_v36 = vmul.f32 %v3196_v37, %v551_v50  ;;  %v638_v18 = vmul.f32 %v3198_v31, %v552_v53  ;;  %v2278_v19 = vpop.eup %2277  ;;  %v3561_v21 = vld [vmem:[#allocation33_spill] sm:$0xff]  ;;  %v3562_v60 = vld [vmem:[#allocation35_spill] sm:$0xff] }
 0x144   : > { %v1900_v54 = vpack.c.bf16 %v640_v49, %v639_v48  ;;  %v1901_v20 = vpack.c.bf16 %v642_v23, %v641_v22  ;;  %v561_v51 = vmul.f32 %v2276_v14, %v3551_v57  ;;  %v562_v4 = vmul.f32 %v2276_v14, %v3552_v55  ;;  %v2280_v56 = vpop.eup %2279  ;;  %v3563_v48 = vld [vmem:[#allocation34_spill] sm:$0xff]  ;;  %v3564_v22 = vld [vmem:[#allocation36_spill] sm:$0xff] }
 0x145   : > { %v1898_v61 = vpack.c.bf16 %v636_v33, %v635_v32  ;;  %v1899_v0 = vpack.c.bf16 %v638_v18, %v637_v36  ;;  %v563_v1 = vmul.f32 %v2276_v14, %v3553_v26  ;;  %v564_v38 = vmul.f32 %v2276_v14, %v3554_v62  ;;  %v2282_v11 = vpop.eup %2281  ;;  %v3565_v36 = vld [vmem:[#allocation37_spill] sm:$0xff] }
 0x146   : > { %877 = vst [vmem:[#allocation2 + $0x40] sm:$0xff] %v1900_v54  ;;  %878 = vst [vmem:[#allocation2 + $0xc8] sm:$0xff] %v1901_v20  ;;  %v647_v63 = vmul.f32 %v3192_v41, %v561_v51  ;;  %v648_v2 = vmul.f32 %v3194_v6, %v562_v4  ;;  %v557_v28 = vmul.f32 %v2278_v19, %v3555_v3  ;;  %v2284_v5 = vpop.eup %2283  ;;  %v3566_v51 = vld [vmem:[#allocation38_spill] sm:$0xff] }
 0x147   : > { %v558_v13 = vmul.f32 %v2278_v19, %v3556_v12  ;;  %875 = vst [vmem:[#allocation2 + $0x38] sm:$0xff] %v1898_v61  ;;  %876 = vst [vmem:[#allocation2 + $0x58] sm:$0xff] %v1899_v0  ;;  %v649_v30 = vmul.f32 %v3196_v37, %v563_v1  ;;  %v650_v7 = vmul.f32 %v3198_v31, %v564_v38  ;;  %v2286_v14 = vpop.eup %2285  ;;  %v3567_v0 = vld [vmem:[#allocation39_spill] sm:$0xff] }
 0x148   : > { %v559_v25 = vmul.f32 %v2278_v19, %v3557_v8  ;;  %v560_v34 = vmul.f32 %v2278_v19, %v3558_v52  ;;  %v1904_v17 = vpack.c.bf16 %v648_v2, %v647_v63  ;;  %v643_v45 = vmul.f32 %v3192_v41, %v557_v28  ;;  %v3568_v28 = vld [vmem:[#allocation40_spill] sm:$0xff] }
 0x149   : > { %v644_v9 = vmul.f32 %v3194_v6, %v558_v13  ;;  %v569_v27 = vmul.f32 %v2280_v56, %v3559_v46  ;;  %v1905_v10 = vpack.c.bf16 %v650_v7, %v649_v30  ;;  %v570_v44 = vmul.f32 %v2280_v56, %v3560_v40  ;;  %v3569_v7 = vld [vmem:[#allocation41_spill] sm:$0xff] }
 0x14a   : > { %v645_v35 = vmul.f32 %v3196_v37, %v559_v25  ;;  %v646_v39 = vmul.f32 %v3198_v31, %v560_v34  ;;  %881 = vst [vmem:[#allocation2 + $0x70] sm:$0xff] %v1904_v17  ;;  %v571_v42 = vmul.f32 %v2280_v56, %v3561_v21  ;;  %v572_v47 = vmul.f32 %v2280_v56, %v3562_v60 }
 0x14b   : > { %v1902_v24 = vpack.c.bf16 %v644_v9, %v643_v45  ;;  %v655_v50 = vmul.f32 %v3192_v41, %v569_v27  ;;  %882 = vst [vmem:[#allocation2 + $0xc0] sm:$0xff] %v1905_v10  ;;  %v656_v53 = vmul.f32 %v3194_v6, %v570_v44  ;;  %v565_v49 = vmul.f32 %v2282_v11, %v3563_v48 }
 0x14c   : > { %v1903_v59 = vpack.c.bf16 %v646_v39, %v645_v35  ;;  %v566_v23 = vmul.f32 %v2282_v11, %v3564_v22  ;;  %v657_v32 = vmul.f32 %v3196_v37, %v571_v42  ;;  %v658_v33 = vmul.f32 %v3198_v31, %v572_v47 }
 0x14d   : > { %879 = vst [vmem:[#allocation2 + $0xe0] sm:$0xff] %v1902_v24  ;;  %v567_v18 = vmul.f32 %v2282_v11, %v3565_v36  ;;  %v568_v19 = vmul.f32 %v2282_v11, %v3146_v15  ;;  %v1908_v54 = vpack.c.bf16 %v656_v53, %v655_v50  ;;  %v651_v20 = vmul.f32 %v3192_v41, %v565_v49 }
 0x14e   : > { %880 = vst [vmem:[#allocation2 + $0x90] sm:$0xff] %v1903_v59  ;;  %v652_v57 = vmul.f32 %v3194_v6, %v566_v23  ;;  %v577_v55 = vmul.f32 %v2284_v5, %v3566_v51  ;;  %v1909_v4 = vpack.c.bf16 %v658_v33, %v657_v32  ;;  %v578_v26 = vmul.f32 %v2284_v5, %v3567_v0 }
 0x14f   : > { %v653_v56 = vmul.f32 %v3196_v37, %v567_v18  ;;  %v654_v61 = vmul.f32 %v3198_v31, %v568_v19  ;;  %885 = vst [vmem:[#allocation2 + $0x10] sm:$0xff] %v1908_v54  ;;  %v579_v62 = vmul.f32 %v2284_v5, %v3151_v43  ;;  %v580_v15 = vmul.f32 %v2284_v5, %v3177_v29 }
 0x150   : > { %v1906_v1 = vpack.c.bf16 %v652_v57, %v651_v20  ;;  %v663_v38 = vmul.f32 %v3192_v41, %v577_v55  ;;  %886 = vst [vmem:[#allocation2 + $0x28] sm:$0xff] %v1909_v4  ;;  %v664_v2 = vmul.f32 %v3194_v6, %v578_v26  ;;  %v573_v3 = vmul.f32 %v2286_v14, %v3158_v16 }
 0x151   : > { %v1907_v63 = vpack.c.bf16 %v654_v61, %v653_v56  ;;  %v574_v12 = vmul.f32 %v2286_v14, %v3568_v28  ;;  %v665_v13 = vmul.f32 %v3196_v37, %v579_v62  ;;  %v666_v30 = vmul.f32 %v3198_v31, %v580_v15 }
 0x152   : > { %883 = vst [vmem:[#allocation2 + $0xa8] sm:$0xff] %v1906_v1  ;;  %v575_v8 = vmul.f32 %v2286_v14, %v3569_v7  ;;  %v576_v43 = vmul.f32 %v2286_v14, %v3184_v58  ;;  %v1912_v29 = vpack.c.bf16 %v664_v2, %v663_v38  ;;  %v659_v25 = vmul.f32 %v3192_v41, %v573_v3 }
 0x153   : > { %884 = vst [vmem:[#allocation2 + $0xd0] sm:$0xff] %v1907_v63  ;;  %v660_v52 = vmul.f32 %v3194_v6, %v574_v12  ;;  %v1913_v34 = vpack.c.bf16 %v666_v30, %v665_v13 }
 0x154   : > { %v661_v16 = vmul.f32 %v3196_v37, %v575_v8  ;;  %v662_v11 = vmul.f32 %v3198_v31, %v576_v43  ;;  %889 = vst [vmem:[#allocation2 + $0x20] sm:$0xff] %v1912_v29 }
 0x155   : > { %v1910_v17 = vpack.c.bf16 %v660_v52, %v659_v25  ;;  %890 = vst [vmem:[#allocation2 + $0x98] sm:$0xff] %v1913_v34 }
 0x156   : > { %v1911_v45 = vpack.c.bf16 %v662_v11, %v661_v16 }
 0x157   : > { %887 = vst [vmem:[#allocation2 + $0xa0] sm:$0xff] %v1910_v17 }
 0x158   : > { %888 = vst [vmem:[#allocation2 + $0xf8] sm:$0xff] %v1911_v45 }
 0x159 PF: > { %v2287_v58 = vld [vmem:[%s2860_s3 + $0x78] sm:$0xff]   ;;  %v2291_v31 = vld [vmem:[%s2860_s3 + $0x70] sm:$0xff]   ;;  %v2295_v10 = vld [vmem:[%s2860_s3 + $0x68] sm:$0xff]   ;;  %s3570_s18 = sld [smem:[#allocation15_spill]]  ;;  %s1629_s29 = sshll.u32 %s2869_s8, 4  ;;  %s3381_s29 = int_to_ptr.vmem [resolvable:$true] %s1629_s29 }
 0x15a   : > { %v2288_v41 = vld [vmem:[%s2860_s3 + $0xf8] sm:$0xff]   ;;  %1978 = vmatprep.subr.bf16.mxu0 %v2287_v58  ;;  %v2292_v9 = vld [vmem:[%s2860_s3 + $0xf0] sm:$0xff]   ;;  %v2296_v35 = vld [vmem:[%s2860_s3 + $0xe8] sm:$0xff]   ;;  %s3571_s10 = sld [smem:[#allocation14_spill]]  ;;  %s3386_s6 = scalar_lea.sflag [#allocation5], %s250_s1 }
 0x15b   : > { %v2289_v6 = vld [vmem:[%s2860_s3 + $0x38] sm:$0xff]   ;;  %2042 = vmatprep.subr.bf16.mxu1 %v2288_v41  ;;  %v2293_v46 = vld [vmem:[%s2860_s3 + $0x30] sm:$0xff]   ;;  %v2297_v39 = vld [vmem:[%s2860_s3 + $0x28] sm:$0xff]   ;;  %s3572_s22 = sld [smem:[#allocation44_spill]]  ;;  %p3574_p9 = scmp.ne.s32.totalorder %s3513_s15, 0 }
 0x15c   : > { %v2290_v37 = vld [vmem:[%s2860_s3 + $0xb8] sm:$0xff]   ;;  %1979 = vmatpush3.bf16.msra.mxu0 %v2289_v6  ;;  %v2294_v27 = vld [vmem:[%s2860_s3 + $0xb0] sm:$0xff]   ;;  %v2298_v40 = vld [vmem:[%s2860_s3 + $0xa8] sm:$0xff]   ;;  %s2598_s21 = smov [#allocation9]  }
 0x15d   : > { %2043 = vmatpush3.bf16.msra.mxu1 %v2290_v37  ;;  %1980 = vmatprep.subr.bf16.mxu0 %v2291_v31  ;;  %v2299_v44 = vld [vmem:[%s2860_s3 + $0x60] sm:$0xff]   ;;  %v2303_v42 = vld [vmem:[%s2860_s3 + $0x58] sm:$0xff]   ;;  %v2307_v59 = vld [vmem:[%s2860_s3 + $0x50] sm:$0xff]   ;;  %s2441_s5 = sshll.u32 %s2598_s21, 4  ;;  %s2442_s5 = int_to_ptr.vmem [resolvable:$false] %s2441_s5 }
 0x15e   : > { %2044 = vmatprep.subr.bf16.mxu1 %v2292_v9  ;;  %v2300_v5 = vld [vmem:[%s2860_s3 + $0xe0] sm:$0xff]   ;;  %v2304_v60 = vld [vmem:[%s2860_s3 + $0xd8] sm:$0xff]   ;;  %v2308_v53 = vld [vmem:[%s2860_s3 + $0xd0] sm:$0xff]   ;;  %p2444_p13 = scmp.lt.s32.totalorder %s3381_s29, %s2442_s5 }
 0x15f   : > { %v2301_v24 = vld [vmem:[%s2860_s3 + $0x20] sm:$0xff]   ;;  %v2305_v47 = vld [vmem:[%s2860_s3 + $0x18] sm:$0xff]   ;;  %v2309_v48 = vld [vmem:[%s2860_s3 + $0x10] sm:$0xff]   ;;  %s1930_s9 = sshll.u32 %s3570_s18, 7  ;;  %s2443_s18 = scalar_lea.vmem %s2442_s5, 2048 }
 0x160   : > { %1981 = vmatpush3.bf16.msra.mxu0 %v2293_v46  ;;  %v2302_v21 = vld [vmem:[%s2860_s3 + $0xa0] sm:$0xff]   ;;  %v2306_v50 = vld [vmem:[%s2860_s3 + $0x98] sm:$0xff]   ;;  %v2310_v49 = vld [vmem:[%s2860_s3 + $0x90] sm:$0xff]   ;;  %s1626_s26 = sadd.s32 %s3571_s10, %s1930_s9 }
 0x161   : > { %2045 = vmatpush3.bf16.msra.mxu1 %v2294_v27  ;;  %1982 = vmatprep.subr.bf16.mxu0 %v2295_v10  ;;  %v2311_v22 = vld [vmem:[%s2860_s3 + $0x48] sm:$0xff]   ;;  %v2315_v33 = vld [vmem:[%s2860_s3 + $0x40] sm:$0xff]   ;;  %v2321_v20 = vld [vmem:[#allocation2 + $0xb4] ss:$40 sps:$4 sm:$0xff]   ;;  %s1877_s4 = sshll.u32 %s1626_s26, 6  ;;  %s3573_s11 = smov %s3572_s22 }
 0x162   : > { %2046 = vmatprep.subr.bf16.mxu1 %v2296_v35  ;;  %v2312_v23 = vld [vmem:[%s2860_s3 + $0xc8] sm:$0xff]   ;;  %v2316_v36 = vld [vmem:[%s2860_s3 + $0xc0] sm:$0xff]   ;;  %v2322_v57 = vld [vmem:[#allocation2] ss:$24 sps:$4 sm:$0xff]   ;;  %1371 = vmatprep.mubr.bf16.mxu0 %v2321_v20  ;;  %s3379_s24 = scalar_lea.hbm %s3572_s22, %s1877_s4 }
 0x163   : > { %v2313_v14 = vld [vmem:[%s2860_s3 + $0x8] sm:$0xff]   ;;  %v2317_v18 = vld [vmem:[%s2860_s3] sm:$0xff]   ;;  %v2333_v28 = vld [vmem:[#allocation2 + $0xf4] ss:$-120 sps:$4 sm:$0xff]  }
 0x164   : > { %1983 = vmatpush3.bf16.msra.mxu0 %v2297_v39  ;;  %v2314_v32 = vld [vmem:[%s2860_s3 + $0x88] sm:$0xff]   ;;  %v2318_v19 = vld [vmem:[%s2860_s3 + $0x80] sm:$0xff]   ;;  %v2341_v8 = vld [vmem:[#allocation2 + $0x38] ss:$8 sps:$4 sm:$0xff]   ;;  %s2437_s3 = scalar_lea.vmem %s3381_s29, 1024 }
 0x165   : > { %2047 = vmatpush3.bf16.msra.mxu1 %v2298_v40  ;;  %1984 = vmatprep.subr.bf16.mxu0 %v2299_v44  ;;  %v2319_v54 = vld [vmem:[#allocation2 + $0xb0] ss:$40 sps:$4 sm:$0xff]   ;;  %v2324_v51 = vld [vmem:[#allocation2 + $0x4] ss:$24 sps:$4 sm:$0xff]   ;;  %v896_v56 = vld [vmem:[#allocation2 + $0x68] sm:$0xff]  ;;  %p2438_p2 = scmp.ne.s32.totalorder %s3381_s29, %s2437_s3  ;;  %p2445_p10 = scmp.lt.s32.totalorder %s2443_s18, %s2437_s3 }
 0x166   : > { %2048 = vmatprep.subr.bf16.mxu1 %v2300_v5  ;;  %v895_v55 = vld [vmem:[#allocation2 + $0x50] sm:$0xff]  ;;  %v898_v61 = vld [vmem:[#allocation2 + $0x48] sm:$0xff]  ;;  %1468 = vmatprep.mubr.bf16.mxu1 %v2324_v51  ;;  %v2337_v30 = vld [vmem:[#allocation2 + $0x3c] ss:$8 sps:$4 sm:$0xff]  }
 0x167   : > { %v897_v4 = vld [vmem:[#allocation2 + $0x30] sm:$0xff]  ;;  %v1801_v26 = vcombine.high %v896_v56, %v898_v61  ;;  %v1800_v62 = vcombine.low %v896_v56, %v898_v61  ;;  %v2325_v15 = vld [vmem:[#allocation2 + $0x84] ss:$104 sps:$4 sm:$0xff]   ;;  %v2329_v63 = vld [vmem:[#allocation2 + $0x80] ss:$104 sps:$4 sm:$0xff]   ;;  %p2439_p8 = pnand %p2438_p2, %p3574_p9  ;;  %p2446_p6 = por %p2445_p10, %p2444_p13 }
 0x168   : > { %1985 = vmatpush3.bf16.msra.mxu0 %v2301_v24  ;;  %v1799_v0 = vcombine.high %v895_v55, %v897_v4  ;;  %v1798_v1 = vcombine.low %v895_v55, %v897_v4  ;;  %v2327_v38 = vld [vmem:[#allocation2 + $0x8c] ss:$48 sps:$4 sm:$0xff]   ;;  %v2330_v2 = vld [vmem:[#allocation2 + $0x88] ss:$48 sps:$4 sm:$0xff]   ;;  %v2343_v29 = vld [vmem:[#allocation2 + $0xe4] ss:$-112 sps:$4 sm:$0xff]  }
 0x169   : > { %2049 = vmatpush3.bf16.msra.mxu1 %v2302_v21  ;;  %1986 = vmatprep.subr.bf16.mxu0 %v2303_v42  ;;  %v2331_v3 = vld [vmem:[#allocation2 + $0x64] ss:$-88 sps:$4 sm:$0xff]   ;;  %v2335_v12 = vld [vmem:[#allocation2 + $0x60] ss:$-88 sps:$4 sm:$0xff]   ;;  %v2336_v13 = vld [vmem:[#allocation2 + $0xf0] ss:$-120 sps:$4 sm:$0xff]   ;;  %p2440_p1 = pneg %p2439_p8 }
 0x16a   : > { %2050 = vmatprep.subr.bf16.mxu1 %v2304_v60  ;;  %v2339_v7 = vld [vmem:[#allocation2 + $0x5c] ss:$112 sps:$4 sm:$0xff]   ;;  %v2342_v43 = vld [vmem:[#allocation2 + $0x58] ss:$112 sps:$4 sm:$0xff]   ;;  %v2345_v25 = vld [vmem:[#allocation2 + $0x94] ss:$48 sps:$4 sm:$0xff]  }
 0x16b   : > { %v2347_v52 = vld [vmem:[#allocation2 + $0xe0] ss:$-112 sps:$4 sm:$0xff]   ;;  %v2349_v16 = vld [vmem:[#allocation2 + $0xac] ss:$-152 sps:$4 sm:$0xff]   ;;  %v920_v58 = vld [vmem:[#allocation2 + $0xf8] sm:$0xff]  ;;  %p2447_p3 = pnand %p2446_p6, %p2440_p1 }
 0x16c   : > { %1987 = vmatpush3.bf16.msra.mxu0 %v2305_v47  ;;  %v2348_v34 = vld [vmem:[#allocation2 + $0x90] ss:$48 sps:$4 sm:$0xff]   ;;  %v2351_v11 = vld [vmem:[#allocation2 + $0xd4] ss:$-168 sps:$4 sm:$0xff]   ;;  %v922_v41 = vld [vmem:[#allocation2 + $0x98] sm:$0xff] }
 0x16d   : > { %2051 = vmatpush3.bf16.msra.mxu1 %v2306_v50  ;;  %1988 = vmatprep.subr.bf16.mxu0 %v2307_v59  ;;  %v919_v17 = vld [vmem:[#allocation2 + $0xa0] sm:$0xff]  ;;  %v2353_v6 = vld [vmem:[#allocation2 + $0xa8] ss:$-152 sps:$4 sm:$0xff]   ;;  %v1825_v9 = vcombine.high %v920_v58, %v922_v41  ;;  %v1824_v27 = vcombine.low %v920_v58, %v922_v41 }
 0x16e   : > { %2052 = vmatprep.subr.bf16.mxu1 %v2308_v53  ;;  %v921_v45 = vld [vmem:[#allocation2 + $0x20] sm:$0xff]  ;;  %v2354_v37 = vld [vmem:[#allocation2 + $0xd0] ss:$-168 sps:$4 sm:$0xff]  }
 0x16f   : > { %v1823_v31 = vcombine.high %v919_v17, %v921_v45  ;;  %v1822_v46 = vcombine.low %v919_v17, %v921_v45 }
 0x170   : > { %1989 = vmatpush3.bf16.msra.mxu0 %v2309_v48 }
 0x171   : > { %2053 = vmatpush3.bf16.msra.mxu1 %v2310_v49  ;;  %1990 = vmatprep.subr.bf16.mxu0 %v2311_v22 }
 0x172   : > { %2054 = vmatprep.subr.bf16.mxu1 %v2312_v23 }
 0x174   : > { %1991 = vmatpush3.bf16.msra.mxu0 %v2313_v14 }
 0x175   : > { %2055 = vmatpush3.bf16.msra.mxu1 %v2314_v32  ;;  %1992 = vmatprep.subr.bf16.mxu0 %v2315_v33 }
 0x176   : > { %2056 = vmatprep.subr.bf16.mxu1 %v2316_v36 }
 0x178   : > { %1993 = vmatpush3.bf16.msra.mxu0 %v2317_v18 }
 0x179   : > { %2057 = vmatpush3.bf16.msra.mxu1 %v2318_v19 }
 0x17b   : > { %1372 = vmatmul.mubr.bf16.vlgmr.msra.gmra.mxu0 %v2319_v54 }
 0x17c   : > { %1469 = vmatmul.mubr.bf16.vlgmr.msra.gmra.mxu1 %v2322_v57  ;;  %1379 = vmatprep.mubr.bf16.mxu0 %v1799_v0 }
 0x17d   : > { %1476 = vmatprep.mubr.bf16.mxu1 %v1801_v26 }
 0x183   : > { %1380 = vmatmul.mubr.bf16.gmra.mxu0 %v1798_v1 }
 0x184   : > { %1477 = vmatmul.mubr.bf16.gmra.mxu1 %v1800_v62  ;;  %1387 = vmatprep.mubr.bf16.mxu0 %v2325_v15 }
 0x185   : > { %1484 = vmatprep.mubr.bf16.mxu1 %v2327_v38 }
 0x18b   : > { %1388 = vmatmul.mubr.bf16.gmra.mxu0 %v2329_v63 }
 0x18c   : > { %1485 = vmatmul.mubr.bf16.gmra.mxu1 %v2330_v2  ;;  %1395 = vmatprep.mubr.bf16.mxu0 %v2331_v3 }
 0x18d   : > { %1492 = vmatprep.mubr.bf16.mxu1 %v2333_v28 }
 0x193   : > { %1396 = vmatmul.mubr.bf16.gmra.mxu0 %v2335_v12 }
 0x194   : > { %1493 = vmatmul.mubr.bf16.gmra.mxu1 %v2336_v13  ;;  %1403 = vmatprep.mubr.bf16.mxu0 %v2337_v30 }
 0x195   : > { %1500 = vmatprep.mubr.bf16.mxu1 %v2339_v7 }
 0x19b   : > { %1404 = vmatmul.mubr.bf16.gmra.mxu0 %v2341_v8 }
 0x19c   : > { %1501 = vmatmul.mubr.bf16.gmra.mxu1 %v2342_v43  ;;  %1411 = vmatprep.mubr.bf16.mxu0 %v2343_v29 }
 0x19d   : > { %1508 = vmatprep.mubr.bf16.mxu1 %v2345_v25 }
 0x1a3   : > { %1412 = vmatmul.mubr.bf16.gmra.mxu0 %v2347_v52 }
 0x1a4   : > { %1509 = vmatmul.mubr.bf16.gmra.mxu1 %v2348_v34  ;;  %1419 = vmatprep.mubr.bf16.mxu0 %v2349_v16 }
 0x1a5   : > { %1516 = vmatprep.mubr.bf16.mxu1 %v2351_v11 }
 0x1ab   : > { %1420 = vmatmul.mubr.bf16.gmra.mxu0 %v2353_v6 }
 0x1ac   : > { %1517 = vmatmul.mubr.bf16.gmra.mxu1 %v2354_v37  ;;  %1427 = vmatprep.mubr.bf16.mxu0 %v1823_v31 }
 0x1ad   : > { %1524 = vmatprep.mubr.bf16.mxu1 %v1825_v9 }
 0x1b3   : > { %1428 = vmatmul.mubr.bf16.gmra.mxu0 %v1822_v46 }
 0x1b4   : > { %1525 = vmatmul.mubr.bf16.gmra.mxu1 %v1824_v27 }
 0x23b   : > { %v1994_v10 = vpop.f32.mrf.mxu0 }
 0x23c   : > { %v2058_v35 = vpop.f32.mrf.mxu1 }
 0x23d   : > { %v1995_v39 = vpop.f32.mrf.mxu0 }
 0x23e   : > { %v2059_v40 = vpop.f32.mrf.mxu1  ;;  %v1996_v24 = vadd.f32 %v1995_v39, %v1994_v10 }
 0x23f   : > { %v1997_v44 = vpop.f32.mrf.mxu0  ;;  %v2060_v21 = vadd.f32 %v2059_v40, %v2058_v35 }
 0x240   : > { %v2061_v5 = vpop.f32.mrf.mxu1 }
 0x241   : > { %v1998_v42 = vpop.f32.mrf.mxu0  ;;  %v1471_v48 = vadd.f32 %v2060_v21, %v1996_v24 }
 0x242   : > { %v1999_v60 = vadd.f32 %v1998_v42, %v1997_v44  ;;  %v2062_v47 = vpop.f32.mrf.mxu1 }
 0x243   : > { %v2063_v50 = vadd.f32 %v2062_v47, %v2061_v5  ;;  %v2000_v59 = vpop.f32.mrf.mxu0 }
 0x244   : > { %v2064_v53 = vpop.f32.mrf.mxu1 }
 0x245   : > { %v1474_v49 = vadd.f32 %v2063_v50, %v1999_v60  ;;  %v2001_v22 = vpop.f32.mrf.mxu0 }
 0x246   : > { %v2065_v23 = vpop.f32.mrf.mxu1  ;;  %v2002_v36 = vadd.f32 %v2001_v22, %v2000_v59 }
 0x247   : > { %v1934_v14 = vpack.c.bf16 %v1474_v49, %v1471_v48  ;;  %v2003_v32 = vpop.f32.mrf.mxu0  ;;  %v2066_v18 = vadd.f32 %v2065_v23, %v2064_v53 }
 0x248   : > { %v2067_v33 = vpop.f32.mrf.mxu1 }
 0x249   : > { %1935 = vst [vmem:[%s2869_s8] sm:$0xff] %v1934_v14   ;;  %v2004_v19 = vpop.f32.mrf.mxu0  ;;  %v1479_v4 = vadd.f32 %v2066_v18, %v2002_v36 }
 0x24a   : > { %v2005_v54 = vadd.f32 %v2004_v19, %v2003_v32  ;;  %v2068_v20 = vpop.f32.mrf.mxu1 }
 0x24b   : > { %v2069_v57 = vadd.f32 %v2068_v20, %v2067_v33  ;;  %v2006_v51 = vpop.f32.mrf.mxu0 }
 0x24c   : > { %v2070_v55 = vpop.f32.mrf.mxu1 }
 0x24d   : > { %v1482_v56 = vadd.f32 %v2069_v57, %v2005_v54  ;;  %v2007_v61 = vpop.f32.mrf.mxu0 }
 0x24e   : > { %v2071_v0 = vpop.f32.mrf.mxu1  ;;  %v2008_v15 = vadd.f32 %v2007_v61, %v2006_v51 }
 0x24f   : > { %v1939_v26 = vpack.c.bf16 %v1482_v56, %v1479_v4  ;;  %v2009_v1 = vpop.f32.mrf.mxu0  ;;  %v2072_v38 = vadd.f32 %v2071_v0, %v2070_v55 }
 0x250   : > { %v2073_v62 = vpop.f32.mrf.mxu1 }
 0x251   : > { %1971 = vst [vmem:[%s2869_s8 + $0x8] sm:$0xff] %v1939_v26   ;;  %v2010_v63 = vpop.f32.mrf.mxu0  ;;  %v1487_v30 = vadd.f32 %v2072_v38, %v2008_v15 }
 0x252   : > { %v2011_v2 = vadd.f32 %v2010_v63, %v2009_v1  ;;  %v2074_v3 = vpop.f32.mrf.mxu1 }
 0x253   : > { %v2075_v28 = vadd.f32 %v2074_v3, %v2073_v62  ;;  %v2012_v12 = vpop.f32.mrf.mxu0 }
 0x254   : > { %v2076_v13 = vpop.f32.mrf.mxu1 }
 0x255   : > { %v1490_v7 = vadd.f32 %v2075_v28, %v2011_v2  ;;  %v2013_v8 = vpop.f32.mrf.mxu0 }
 0x256   : > { %v2077_v43 = vpop.f32.mrf.mxu1  ;;  %v2014_v34 = vadd.f32 %v2013_v8, %v2012_v12 }
 0x257   : > { %v1944_v29 = vpack.c.bf16 %v1490_v7, %v1487_v30  ;;  %v2015_v25 = vpop.f32.mrf.mxu0  ;;  %v2078_v16 = vadd.f32 %v2077_v43, %v2076_v13 }
 0x258   : > { %v2079_v52 = vpop.f32.mrf.mxu1 }
 0x259   : > { %1972 = vst [vmem:[%s2869_s8 + $0x10] sm:$0xff] %v1944_v29   ;;  %v2016_v11 = vpop.f32.mrf.mxu0  ;;  %v1495_v37 = vadd.f32 %v2078_v16, %v2014_v34 }
 0x25a   : > { %v2017_v17 = vadd.f32 %v2016_v11, %v2015_v25  ;;  %v2080_v45 = vpop.f32.mrf.mxu1 }
 0x25b   : > { %v2081_v58 = vadd.f32 %v2080_v45, %v2079_v52  ;;  %v2018_v41 = vpop.f32.mrf.mxu0 }
 0x25c   : > { %v2082_v6 = vpop.f32.mrf.mxu1 }
 0x25d   : > { %v1498_v31 = vadd.f32 %v2081_v58, %v2017_v17  ;;  %v2019_v9 = vpop.f32.mrf.mxu0 }
 0x25e   : > { %v2083_v46 = vpop.f32.mrf.mxu1  ;;  %v2020_v39 = vadd.f32 %v2019_v9, %v2018_v41 }
 0x25f   : > { %v1949_v27 = vpack.c.bf16 %v1498_v31, %v1495_v37  ;;  %v2021_v10 = vpop.f32.mrf.mxu0  ;;  %v2084_v40 = vadd.f32 %v2083_v46, %v2082_v6 }
 0x260   : > { %v2085_v35 = vpop.f32.mrf.mxu1 }
 0x261   : > { %1973 = vst [vmem:[%s2869_s8 + $0x18] sm:$0xff] %v1949_v27   ;;  %v2022_v44 = vpop.f32.mrf.mxu0  ;;  %v1503_v47 = vadd.f32 %v2084_v40, %v2020_v39 }
 0x262   : > { %v2023_v5 = vadd.f32 %v2022_v44, %v2021_v10  ;;  %v2086_v24 = vpop.f32.mrf.mxu1 }
 0x263   : > { %v2087_v21 = vadd.f32 %v2086_v24, %v2085_v35  ;;  %v2024_v42 = vpop.f32.mrf.mxu0 }
 0x264   : > { %v2088_v60 = vpop.f32.mrf.mxu1 }
 0x265   : > { %v1506_v50 = vadd.f32 %v2087_v21, %v2023_v5  ;;  %v2025_v59 = vpop.f32.mrf.mxu0 }
 0x266   : > { %v2089_v53 = vpop.f32.mrf.mxu1  ;;  %v2026_v23 = vadd.f32 %v2025_v59, %v2024_v42 }
 0x267   : > { %v1954_v48 = vpack.c.bf16 %v1506_v50, %v1503_v47  ;;  %v2027_v49 = vpop.f32.mrf.mxu0  ;;  %v2090_v14 = vadd.f32 %v2089_v53, %v2088_v60 }
 0x268   : > { %v2091_v22 = vpop.f32.mrf.mxu1 }
 0x269   : > { %1974 = vst [vmem:[%s2869_s8 + $0x20] sm:$0xff] %v1954_v48   ;;  %v2028_v32 = vpop.f32.mrf.mxu0  ;;  %v1511_v20 = vadd.f32 %v2090_v14, %v2026_v23 }
 0x26a   : > { %v2029_v33 = vadd.f32 %v2028_v32, %v2027_v49  ;;  %v2092_v36 = vpop.f32.mrf.mxu1 }
 0x26b   : > { %v2093_v18 = vadd.f32 %v2092_v36, %v2091_v22  ;;  %v2030_v19 = vpop.f32.mrf.mxu0 }
 0x26c   : > { %v2094_v54 = vpop.f32.mrf.mxu1 }
 0x26d   : > { %v1514_v57 = vadd.f32 %v2093_v18, %v2029_v33  ;;  %v2031_v51 = vpop.f32.mrf.mxu0 }
 0x26e   : > { %v2095_v55 = vpop.f32.mrf.mxu1  ;;  %v2032_v0 = vadd.f32 %v2031_v51, %v2030_v19 }
 0x26f   : > { %v1959_v4 = vpack.c.bf16 %v1514_v57, %v1511_v20  ;;  %v2033_v56 = vpop.f32.mrf.mxu0  ;;  %v2096_v26 = vadd.f32 %v2095_v55, %v2094_v54 }
 0x270   : > { %v2097_v61 = vpop.f32.mrf.mxu1 }
 0x271   : > { %1975 = vst [vmem:[%s2869_s8 + $0x28] sm:$0xff] %v1959_v4   ;;  %v2034_v1 = vpop.f32.mrf.mxu0  ;;  %v1519_v3 = vadd.f32 %v2096_v26, %v2032_v0 }
 0x272   : > { %v2035_v62 = vadd.f32 %v2034_v1, %v2033_v56  ;;  %v2098_v15 = vpop.f32.mrf.mxu1 }
 0x273   : > { %v2099_v38 = vadd.f32 %v2098_v15, %v2097_v61  ;;  %v2036_v63 = vpop.f32.mrf.mxu0 }
 0x274   : > { %v2100_v2 = vpop.f32.mrf.mxu1 }
 0x275   : > { %v1522_v28 = vadd.f32 %v2099_v38, %v2035_v62  ;;  %v2037_v12 = vpop.f32.mrf.mxu0 }
 0x276   : > { %v2101_v13 = vpop.f32.mrf.mxu1  ;;  %v2038_v43 = vadd.f32 %v2037_v12, %v2036_v63 }
 0x277   : > { %v1964_v30 = vpack.c.bf16 %v1522_v28, %v1519_v3  ;;  %v2039_v7 = vpop.f32.mrf.mxu0  ;;  %v2102_v29 = vadd.f32 %v2101_v13, %v2100_v2 }
 0x278   : > { %v2103_v8 = vpop.f32.mrf.mxu1 }
 0x279   : > { %1976 = vst [vmem:[%s2869_s8 + $0x30] sm:$0xff] %v1964_v30   ;;  %v2040_v25 = vpop.f32.mrf.mxu0  ;;  %v1527_v11 = vadd.f32 %v2102_v29, %v2038_v43 }
 0x27a   : > { %v2041_v52 = vadd.f32 %v2040_v25, %v2039_v7  ;;  %v2104_v34 = vpop.f32.mrf.mxu1 }
 0x27b   : > { %v2105_v16 = vadd.f32 %v2104_v34, %v2103_v8 }
 0x27d   : > { %v1530_v17 = vadd.f32 %v2105_v16, %v2041_v52 }
 0x27f   : > { %v1969_v45 = vpack.c.bf16 %v1530_v17, %v1527_v11 }
 0x281   : > { %1977 = vst [vmem:[%s2869_s8 + $0x38] sm:$0xff] %v1969_v45  }
 0x282   : > { %2450 = shalt.err (!%p2447_p3)
}
 0x283   : > { %s2451_s1 = scalar_lea.hbm %s3379_s24, 1024  ;;  %s2455_s9 = scalar_lea.hbm %s3573_s11, 16384 }
 0x284   : > { %p2452_p7 = scmp.ne.s32.totalorder %s3379_s24, %s2451_s1  ;;  %p2456_p4 = scmp.lt.s32.totalorder %s3379_s24, %s3573_s11 }
 0x285   : > { %p2457_p12 = scmp.lt.s32.totalorder %s2455_s9, %s2451_s1 }
 0x286   : > { %p2453_p11 = pnand %p2452_p7, %p3574_p9 }
 0x287   : > { %p2458_p0 = por %p2457_p12, %p2456_p4 }
 0x288   : > { %p2454_p5 = pneg %p2453_p11 }
 0x28a   : > { %p2459_p2 = pnand %p2458_p0, %p2454_p5 }
 0x28c   : > { %2462 = shalt.err (!%p2459_p2)
}
 0x28d   : > { %s2599_s7 = smov 64   ;;  %s2600_s0 = smov 512  }
 0x28e   : > { %s2601_s22 = smov 4  }
 0x28f   : > { %2114 = dma.vmem_to_hbm [thread:$0]  (%p3574_p9), %s3381_s29, 1024, %s3379_s24, %s3386_s6, %s2599_s7, %s2600_s0, %s2601_s22  }
 0x290 PF: > { %p2134_p8 = scmp.ge.s32.totalorder %s2589_s25, 2  ;;  %s1644_s3 = sand.u32 1, %s2537_s12  }
 0x291   : > { %p3575_p1 = scmp.ne.s32.totalorder %s3514_s28, 0  ;;  %s1645_s21 = scalar_lea.sflag [#allocation5], %s1644_s3 }
 0x293   : > { %p2128_p13 = pnand %p2134_p8, %p3575_p1 }
 0x295   : > { %p2129_p10 = pneg %p2128_p13 }
 0x297   : > { %2532 = dma.done.wait (%p2129_p10), %s1645_s21, 1024  }
 0x298   : > { %2534 = vsyncadd (%p2129_p10), %s1645_s21, 4294966272  ;;  %s20_s25 = sadd.s32 1, %s2589_s25   ;;  %s3577_s28 = sld [smem:[#allocation19_spill]] }
 0x299   : > { %p3414_p6 = scmp.ge.s32.totalorder %s20_s25, 18   ;;  %s3578_s22 = sld [smem:[#allocation16_spill]] }
 0x29a   : > { %s3579_s29 = sld [smem:[#allocation17_spill]]  ;;  %s3581_s12 = smov %s2541_s13 }
 0x29b   : > { %s3580_s24 = sld [smem:[#allocation18_spill]]  ;;  %s3582_s13 = smov %s2545_s14 }
 0x29c   : > { %s3583_s14 = smov %s2790_s30  ;;  %s3584_s15 = smov %s2553_s16 }
 0x29d   : > { %s3585_s16 = smov %s2557_s17  ;;  %s3586_s17 = smov %s2759_s27 }
 0x29e   : > { %s3587_s18 = smov %s2565_s19  ;;  %s3588_s19 = smov %s2569_s20 }
 0x29f   : > { %s3589_s20 = smov %s3577_s28  ;;  %s3590_s21 = smov %s2581_s23 }
 0x2a0   : > { %s3591_s23 = smov %s3579_s29  ;;  %19 = sbr.rel (!%p3414_p6) target bundleno = 15 (0xf), region = 96 }
 0x2a5   :  { %1650 = vsyncpa [#allocation4], 1 }
 0x2a6   :  { %1652 = vsyncpa [#allocation4 + $0x1], 1 }
 0x2a7   :  { %1653 = vsyncpa [#allocation7], 1 }
 0x2a8   :  { %1654 = vsyncpa [#allocation5], 1 }
 0x2a9   :  { %1656 = vsyncpa [#allocation5 + $0x1], 1 }

</bundles_post_ra>
